<compile_context>
chip_gen: v7x
topology: tpu7x:2x2x1
jax: 0.10.0
libtpu: 0.0.40
codegen_flags: <defaults>
</compile_context>

<pallas_src>
import functools

import jax
import jax.numpy as jnp
from jax.experimental import pallas as pl
from jax.experimental.pallas import tpu as pltpu

LN_EPS = 1e-5  # torch.nn.LayerNorm default eps


def _sgu_kernel(pos_ref, val_ref, mask_ref, w_ref, bias_ref, ib_ref,
                gamma_ref, beta_ref, out_ref, gate_ref, *, heads, d_head, enc_in):
    bt, n, dim = pos_ref.shape

    # --- LayerNorm over channels, one-pass statistics (E[x] and E[x^2] together).
    x = pos_ref[...].astype(jnp.float32)                        # (bt, N, DIM)
    s1 = jnp.mean(x, axis=-1, keepdims=True)
    s2 = jnp.mean(x * x, axis=-1, keepdims=True)
    var = s2 - s1 * s1                                          # biased, like torch
    g = (x - s1) * jax.lax.rsqrt(var + LN_EPS)
    g = g * gamma_ref[...] + beta_ref[...]                      # (1, DIM) broadcasts

    # --- Imputation bias for all heads, accumulated over the small static ENC axis.
    #     Live set stays at (bt, N, DIM); no (bt, N, ENC, DIM) temporary.
    m = 1.0 - mask_ref[...].astype(jnp.float32)                 # (bt, N, ENC)
    combined = g
    for e in range(enc_in):                                     # ENC is small & static
        combined = combined + m[:, :, e:e + 1] * ib_ref[e].astype(jnp.float32)

    # --- Spatial mixing on the MXU.  One bulk rearrange packs all batch elements of
    #     a head into the MXU result columns: (bt, N, H*D) -> (H, N, bt*D); a single
    #     head-batched matmul against W (H, N, N); one bulk rearrange back.
    #     (Same data movement as per-(head,batch) slice+concat, but as 2 bulk
    #     relayouts instead of 2*H*bt copies.)
    cb = combined.astype(jnp.bfloat16).reshape(bt, n, heads, d_head)
    cb = jnp.transpose(cb, (2, 1, 0, 3)).reshape(heads, n, bt * d_head)
    mixed = jax.lax.dot_general(                                 # 'hmn,hnk->hmk'
        w_ref[...], cb, (((2,), (1,)), ((0,), (0,))),
        preferred_element_type=jnp.float32)                     # (H, N, bt*D) f32
    mixed = mixed.reshape(heads, n, bt, d_head)
    gate = jnp.transpose(mixed, (2, 1, 0, 3)).reshape(bt, n, dim)

    # --- Lane-dense epilogue: one bias add, one gating multiply, full-width stores.
    gate = gate + bias_ref[...]                                 # (N, DIM) bias slab
    gate_ref[...] = gate.astype(gate_ref.dtype)
    out_ref[...] = (gate * val_ref[...].astype(jnp.float32)).astype(out_ref.dtype)


def _choose_bt(B, n, dim, enc, d_head):
    # Fill ~256 MXU result columns (v6e/v7x), bounded by an activation-buffer budget,
    # and keep >=2 grid steps so the parallel batch axis can shard across v7x's 2 TCs.
    target = max(1, -(-256 // d_head))
    per_b = 2 * n * (4 * dim * 4 + enc * 4)          # double-buffered act bytes / batch elem
    vmem_cap = max(1, (24 << 20) // per_b)
    bt = max(1, min(B, target, vmem_cap))
    while bt > 1 and B % bt:                         # require an even grid (no remainder block)
        bt -= 1
    if bt > 1 and B // bt < 2:                       # keep >=2 grid steps (megacore)
        bt = bt // 2
        while bt > 1 and B % bt:
            bt -= 1
    return max(1, bt)


def _vmem_limit_bytes(bt, n, dim, enc, heads):
    act = 2 * bt * n * (4 * dim * 4 + enc * 4)                    # double-buffered activation blocks
    par = 2 * (heads * n * n * 2 + enc * n * dim * 2              # weight + impute slab (bf16)
               + n * dim * 4 + 2 * dim * 4)                       # bias slab + gamma/beta (f32)
    tmp = bt * n * (24 * dim + 4 * enc)                           # kernel-internal f32/bf16 temporaries
    need = int((act + par + tmp) * 1.25) + (4 << 20)
    try:
        phys = pltpu.get_tpu_info().vmem_capacity_bytes           # 64 MiB/TC v7x, 128 MiB v5e/v6e
    except Exception:
        phys = 128 << 20
    cap = min(phys * 3 // 4, 100 << 20)                           # leave compiler-scratch headroom
    return int(max(32 << 20, min(need, cap)))


def spatial_gating_unit(value, pos, x_mask, weight, bias, impute_bias,
                        ln_gamma, ln_beta, heads):
    B, N, DIM = pos.shape
    ENC = x_mask.shape[-1]
    D = DIM // heads

    # Wrapper-side layout plumbing only (lane-dense parameter slabs; no compute hoisted):
    w_bf16 = weight.astype(jnp.bfloat16)                                        # (H, N, N)
    ib_all = (impute_bias.astype(jnp.bfloat16)
              .transpose(2, 1, 0, 3).reshape(ENC, N, DIM))                      # (ENC, N, DIM) bf16
    bias_full = jnp.repeat(bias.astype(jnp.float32)[:, :, None], D, axis=-1)
    bias_full = bias_full.transpose(1, 0, 2).reshape(N, DIM)                    # (N, DIM)
    gamma2 = ln_gamma.astype(jnp.float32).reshape(1, DIM)
    beta2 = ln_beta.astype(jnp.float32).reshape(1, DIM)

    bt = _choose_bt(B, N, DIM, ENC, D)
    kernel = functools.partial(_sgu_kernel, heads=heads, d_head=D, enc_in=ENC)

    def run(single_buffer_params):
        if single_buffer_params:
            pmode = pl.Buffered(1)      # grid-invariant blocks: one VMEM buffer is enough
            pspec = lambda shp, imap: pl.BlockSpec(shp, imap, pipeline_mode=pmode)
        else:
            pspec = lambda shp, imap: pl.BlockSpec(shp, imap)
        return pl.pallas_call(
            kernel,
            out_shape=(jax.ShapeDtypeStruct((B, N, DIM), pos.dtype),
                       jax.ShapeDtypeStruct((B, N, DIM), pos.dtype)),
            grid_spec=pltpu.PrefetchScalarGridSpec(
                num_scalar_prefetch=0,
                grid=(B // bt,),
                in_specs=[
                    pl.BlockSpec((bt, N, DIM), lambda i: (i, 0, 0)),     # pos
                    pl.BlockSpec((bt, N, DIM), lambda i: (i, 0, 0)),     # value
                    pl.BlockSpec((bt, N, ENC), lambda i: (i, 0, 0)),     # x_mask
                    pspec((heads, N, N), lambda i: (0, 0, 0)),           # weight (bf16)
                    pspec((N, DIM), lambda i: (0, 0)),                   # bias slab (lane-dense)
                    pspec((ENC, N, DIM), lambda i: (0, 0, 0)),           # impute-bias slab (bf16)
                    pspec((1, DIM), lambda i: (0, 0)),                   # LN gamma
                    pspec((1, DIM), lambda i: (0, 0)),                   # LN beta
                ],
                out_specs=[
                    pl.BlockSpec((bt, N, DIM), lambda i: (i, 0, 0)),     # act(gate) * value
                    pl.BlockSpec((bt, N, DIM), lambda i: (i, 0, 0)),     # gate
                ],
            ),
            compiler_params=pltpu.CompilerParams(
                dimension_semantics=("parallel",),
                vmem_limit_bytes=_vmem_limit_bytes(bt, N, DIM, ENC, heads),
            ),
        )(pos, value, x_mask, w_bf16, bias_full, ib_all, gamma2, beta2)

    try:
        out, gate = run(True)
    except Exception:
        # This Pallas build rejects pipeline_mode=Buffered(1) on a pallas_call
        # BlockSpec -> fall back to the default double-buffered parameter blocks.
        out, gate = run(False)
    return out, gate, x_mask


def _reference(value, pos, x_mask, weight, bias, impute_bias, gamma, beta, heads):
    B, N, DIM = pos.shape
    D = DIM // heads
    mu = pos.mean(-1, keepdims=True)
    var = ((pos - mu) ** 2).mean(-1, keepdims=True)
    g = (pos - mu) / jnp.sqrt(var + LN_EPS) * gamma + beta
    g = g.reshape(B, N, heads, D).transpose(0, 2, 1, 3)            # b h n d
    rmask = 1.0 - jnp.broadcast_to(x_mask[:, None], (B, heads, N, x_mask.shape[-1]))
    mask_bias = jnp.einsum('bhne,hned->bhnd', rmask, impute_bias)
    mask_gate = jnp.einsum('bhnd,hmn->bhmd', mask_bias, weight)
    gg = jnp.einsum('bhnd,hmn->bhmd', g, weight)
    gg = gg + bias[None, :, :, None] + mask_gate
    gg = gg.transpose(0, 2, 1, 3).reshape(B, N, DIM)
    return gg * value, gg


if __name__ == "__main__":
    key = jax.random.PRNGKey(0)
    # batch, dim_seq, dim, heads, enc_in  (DIM a multiple of 128 so the lane-dense
    # paths / full-width stores are actually exercised, as requested by the review).
    B, N, DIM, H, ENC = 4, 8, 128, 2, 7
    D = DIM // H

    k1, k2, k3, k4, k5 = jax.random.split(key, 5)
    value = jax.random.normal(k1, (B, N, DIM), jnp.float32)
    pos = jax.random.normal(k2, (B, N, DIM), jnp.float32)
    x_mask = jax.random.bernoulli(k3, 0.7, (B, N, ENC)).astype(jnp.float32)

    # Deterministic parameter init mirroring __init__:
    init_eps = 0.001 / N                                           # init_eps /= dim_seq
    weight = jax.random.uniform(k4, (H, N, N), jnp.float32, -init_eps, init_eps)
    bias = jnp.ones((H, N), jnp.float32)
    impute_bias = jax.random.normal(k5, (H, N, ENC, D), jnp.float32)
    ln_gamma = jnp.ones((DIM,), jnp.float32)                       # LayerNorm weight
    ln_beta = jnp.zeros((DIM,), jnp.float32)                       # LayerNorm bias

    out, gate, mask_out = spatial_gating_unit(
        value, pos, x_mask, weight, bias, impute_bias, ln_gamma, ln_beta, H)
    jax.block_until_ready((out, gate, mask_out))

    ref_out, ref_gate = _reference(
        value, pos, x_mask, weight, bias, impute_bias, ln_gamma, ln_beta, H)

    # bf16 MXU operands / bf16 impute-bias storage (f32 accumulation): with W ~ 1e-4
    # and an N-term spatial contraction, the absolute error stays well inside 1e-4.
    assert jnp.allclose(out, ref_out, atol=1e-4, rtol=1e-4)
    assert jnp.allclose(gate, ref_gate, atol=1e-4, rtol=1e-4)
    assert jnp.array_equal(mask_out, x_mask)

    print("KERNEL_OK")
</pallas_src>

<mosaic_0001>
module attributes {stable_mosaic.version = 11 : i64} {
  func.func @_sgu_kernel(%arg0: i32, %arg1: memref<2x8x128xf32, #tpu.memory_space<vmem>>, %arg2: memref<2x8x128xf32, #tpu.memory_space<vmem>>, %arg3: memref<2x8x7xf32, #tpu.memory_space<vmem>>, %arg4: memref<2x8x8xbf16, #tpu.memory_space<vmem>>, %arg5: memref<8x128xf32, #tpu.memory_space<vmem>>, %arg6: memref<7x8x128xbf16, #tpu.memory_space<vmem>>, %arg7: memref<1x128xf32, #tpu.memory_space<vmem>>, %arg8: memref<1x128xf32, #tpu.memory_space<vmem>>, %arg9: memref<2x8x128xf32, #tpu.memory_space<vmem>>, %arg10: memref<2x8x128xf32, #tpu.memory_space<vmem>>) attributes {dimension_semantics = [#tpu.dimension_semantics<parallel>], iteration_bounds = array<i64: 2>, scalar_prefetch = 0 : i64, scratch_operands = 0 : i64, tpu.core_type = #tpu.core_type<tc>, window_params = [{transform_indices = @transform_0, window_bounds = array<i64: 2, 8, 128>}, {transform_indices = @transform_1, window_bounds = array<i64: 2, 8, 128>}, {transform_indices = @transform_2, window_bounds = array<i64: 2, 8, 7>}, {pipeline_mode = #tpu.pipeline_mode<synchronous>, transform_indices = @transform_3, window_bounds = array<i64: 2, 8, 8>}, {pipeline_mode = #tpu.pipeline_mode<synchronous>, transform_indices = @transform_4, window_bounds = array<i64: 8, 128>}, {pipeline_mode = #tpu.pipeline_mode<synchronous>, transform_indices = @transform_5, window_bounds = array<i64: 7, 8, 128>}, {pipeline_mode = #tpu.pipeline_mode<synchronous>, transform_indices = @transform_6, window_bounds = array<i64: 1, 128>}, {pipeline_mode = #tpu.pipeline_mode<synchronous>, transform_indices = @transform_7, window_bounds = array<i64: 1, 128>}, {transform_indices = @transform_8, window_bounds = array<i64: 2, 8, 128>}, {transform_indices = @transform_9, window_bounds = array<i64: 2, 8, 128>}]} {
    %c0 = arith.constant 0 : index
    %c0_0 = arith.constant 0 : index
    %c0_1 = arith.constant 0 : index
    %0 = vector.load %arg1[%c0, %c0_0, %c0_1] : memref<2x8x128xf32, #tpu.memory_space<vmem>>, vector<2x8x128xf32>
    %cst = arith.constant dense<0.000000e+00> : vector<2x8xf32>
    %1 = vector.multi_reduction <add>, %0, %cst [2] : vector<2x8x128xf32> to vector<2x8xf32>
    %2 = vector.shape_cast %1 : vector<2x8xf32> to vector<2x8x1xf32>
    %cst_2 = arith.constant 1.280000e+02 : f32
    %3 = vector.broadcast %cst_2 : f32 to vector<2x8x1xf32>
    %4 = arith.divf %2, %3 : vector<2x8x1xf32>
    %5 = arith.mulf %0, %0 : vector<2x8x128xf32>
    %cst_3 = arith.constant dense<0.000000e+00> : vector<2x8xf32>
    %6 = vector.multi_reduction <add>, %5, %cst_3 [2] : vector<2x8x128xf32> to vector<2x8xf32>
    %7 = vector.shape_cast %6 : vector<2x8xf32> to vector<2x8x1xf32>
    %cst_4 = arith.constant 1.280000e+02 : f32
    %8 = vector.broadcast %cst_4 : f32 to vector<2x8x1xf32>
    %9 = arith.divf %7, %8 : vector<2x8x1xf32>
    %10 = arith.mulf %4, %4 : vector<2x8x1xf32>
    %11 = arith.subf %9, %10 : vector<2x8x1xf32>
    %12 = vector.broadcast %4 : vector<2x8x1xf32> to vector<2x8x128xf32>
    %13 = arith.subf %0, %12 : vector<2x8x128xf32>
    %cst_5 = arith.constant 9.99999974E-6 : f32
    %14 = vector.broadcast %cst_5 : f32 to vector<2x8x1xf32>
    %15 = arith.addf %11, %14 : vector<2x8x1xf32>
    %16 = math.rsqrt %15 : vector<2x8x1xf32>
    %17 = vector.broadcast %16 : vector<2x8x1xf32> to vector<2x8x128xf32>
    %18 = arith.mulf %13, %17 : vector<2x8x128xf32>
    %c0_6 = arith.constant 0 : index
    %c0_7 = arith.constant 0 : index
    %19 = vector.load %arg7[%c0_6, %c0_7] : memref<1x128xf32, #tpu.memory_space<vmem>>, vector<1x128xf32>
    %20 = vector.shape_cast %19 : vector<1x128xf32> to vector<1x1x128xf32>
    %21 = vector.broadcast %20 : vector<1x1x128xf32> to vector<2x8x128xf32>
    %22 = arith.mulf %18, %21 : vector<2x8x128xf32>
    %c0_8 = arith.constant 0 : index
    %c0_9 = arith.constant 0 : index
    %23 = vector.load %arg8[%c0_8, %c0_9] : memref<1x128xf32, #tpu.memory_space<vmem>>, vector<1x128xf32>
    %24 = vector.shape_cast %23 : vector<1x128xf32> to vector<1x1x128xf32>
    %25 = vector.broadcast %24 : vector<1x1x128xf32> to vector<2x8x128xf32>
    %26 = arith.addf %22, %25 : vector<2x8x128xf32>
    %c0_10 = arith.constant 0 : index
    %c0_11 = arith.constant 0 : index
    %c0_12 = arith.constant 0 : index
    %27 = vector.load %arg3[%c0_10, %c0_11, %c0_12] : memref<2x8x7xf32, #tpu.memory_space<vmem>>, vector<2x8x7xf32>
    %cst_13 = arith.constant 1.000000e+00 : f32
    %28 = vector.broadcast %cst_13 : f32 to vector<2x8x7xf32>
    %29 = arith.subf %28, %27 : vector<2x8x7xf32>
    %30 = vector.extract_strided_slice %29 {offsets = [0, 0, 0], sizes = [2, 8, 1], strides = [1, 1, 1]} : vector<2x8x7xf32> to vector<2x8x1xf32>
    %c0_14 = arith.constant 0 : index
    %c0_15 = arith.constant 0 : index
    %c0_16 = arith.constant 0 : index
    %31 = vector.load %arg6[%c0_14, %c0_15, %c0_16] : memref<7x8x128xbf16, #tpu.memory_space<vmem>>, vector<1x8x128xbf16>
    %32 = vector.shape_cast %31 : vector<1x8x128xbf16> to vector<8x128xbf16>
    %33 = arith.extf %32 : vector<8x128xbf16> to vector<8x128xf32>
    %34 = vector.shape_cast %33 : vector<8x128xf32> to vector<1x8x128xf32>
    %35 = vector.broadcast %30 : vector<2x8x1xf32> to vector<2x8x128xf32>
    %36 = vector.broadcast %34 : vector<1x8x128xf32> to vector<2x8x128xf32>
    %37 = arith.mulf %35, %36 : vector<2x8x128xf32>
    %38 = arith.addf %26, %37 : vector<2x8x128xf32>
    %39 = vector.extract_strided_slice %29 {offsets = [0, 0, 1], sizes = [2, 8, 1], strides = [1, 1, 1]} : vector<2x8x7xf32> to vector<2x8x1xf32>
    %c1 = arith.constant 1 : index
    %c0_17 = arith.constant 0 : index
    %c0_18 = arith.constant 0 : index
    %40 = vector.load %arg6[%c1, %c0_17, %c0_18] : memref<7x8x128xbf16, #tpu.memory_space<vmem>>, vector<1x8x128xbf16>
    %41 = vector.shape_cast %40 : vector<1x8x128xbf16> to vector<8x128xbf16>
    %42 = arith.extf %41 : vector<8x128xbf16> to vector<8x128xf32>
    %43 = vector.shape_cast %42 : vector<8x128xf32> to vector<1x8x128xf32>
    %44 = vector.broadcast %39 : vector<2x8x1xf32> to vector<2x8x128xf32>
    %45 = vector.broadcast %43 : vector<1x8x128xf32> to vector<2x8x128xf32>
    %46 = arith.mulf %44, %45 : vector<2x8x128xf32>
    %47 = arith.addf %38, %46 : vector<2x8x128xf32>
    %48 = vector.extract_strided_slice %29 {offsets = [0, 0, 2], sizes = [2, 8, 1], strides = [1, 1, 1]} : vector<2x8x7xf32> to vector<2x8x1xf32>
    %c2 = arith.constant 2 : index
    %c0_19 = arith.constant 0 : index
    %c0_20 = arith.constant 0 : index
    %49 = vector.load %arg6[%c2, %c0_19, %c0_20] : memref<7x8x128xbf16, #tpu.memory_space<vmem>>, vector<1x8x128xbf16>
    %50 = vector.shape_cast %49 : vector<1x8x128xbf16> to vector<8x128xbf16>
    %51 = arith.extf %50 : vector<8x128xbf16> to vector<8x128xf32>
    %52 = vector.shape_cast %51 : vector<8x128xf32> to vector<1x8x128xf32>
    %53 = vector.broadcast %48 : vector<2x8x1xf32> to vector<2x8x128xf32>
    %54 = vector.broadcast %52 : vector<1x8x128xf32> to vector<2x8x128xf32>
    %55 = arith.mulf %53, %54 : vector<2x8x128xf32>
    %56 = arith.addf %47, %55 : vector<2x8x128xf32>
    %57 = vector.extract_strided_slice %29 {offsets = [0, 0, 3], sizes = [2, 8, 1], strides = [1, 1, 1]} : vector<2x8x7xf32> to vector<2x8x1xf32>
    %c3 = arith.constant 3 : index
    %c0_21 = arith.constant 0 : index
    %c0_22 = arith.constant 0 : index
    %58 = vector.load %arg6[%c3, %c0_21, %c0_22] : memref<7x8x128xbf16, #tpu.memory_space<vmem>>, vector<1x8x128xbf16>
    %59 = vector.shape_cast %58 : vector<1x8x128xbf16> to vector<8x128xbf16>
    %60 = arith.extf %59 : vector<8x128xbf16> to vector<8x128xf32>
    %61 = vector.shape_cast %60 : vector<8x128xf32> to vector<1x8x128xf32>
    %62 = vector.broadcast %57 : vector<2x8x1xf32> to vector<2x8x128xf32>
    %63 = vector.broadcast %61 : vector<1x8x128xf32> to vector<2x8x128xf32>
    %64 = arith.mulf %62, %63 : vector<2x8x128xf32>
    %65 = arith.addf %56, %64 : vector<2x8x128xf32>
    %66 = vector.extract_strided_slice %29 {offsets = [0, 0, 4], sizes = [2, 8, 1], strides = [1, 1, 1]} : vector<2x8x7xf32> to vector<2x8x1xf32>
    %c4 = arith.constant 4 : index
    %c0_23 = arith.constant 0 : index
    %c0_24 = arith.constant 0 : index
    %67 = vector.load %arg6[%c4, %c0_23, %c0_24] : memref<7x8x128xbf16, #tpu.memory_space<vmem>>, vector<1x8x128xbf16>
    %68 = vector.shape_cast %67 : vector<1x8x128xbf16> to vector<8x128xbf16>
    %69 = arith.extf %68 : vector<8x128xbf16> to vector<8x128xf32>
    %70 = vector.shape_cast %69 : vector<8x128xf32> to vector<1x8x128xf32>
    %71 = vector.broadcast %66 : vector<2x8x1xf32> to vector<2x8x128xf32>
    %72 = vector.broadcast %70 : vector<1x8x128xf32> to vector<2x8x128xf32>
    %73 = arith.mulf %71, %72 : vector<2x8x128xf32>
    %74 = arith.addf %65, %73 : vector<2x8x128xf32>
    %75 = vector.extract_strided_slice %29 {offsets = [0, 0, 5], sizes = [2, 8, 1], strides = [1, 1, 1]} : vector<2x8x7xf32> to vector<2x8x1xf32>
    %c5 = arith.constant 5 : index
    %c0_25 = arith.constant 0 : index
    %c0_26 = arith.constant 0 : index
    %76 = vector.load %arg6[%c5, %c0_25, %c0_26] : memref<7x8x128xbf16, #tpu.memory_space<vmem>>, vector<1x8x128xbf16>
    %77 = vector.shape_cast %76 : vector<1x8x128xbf16> to vector<8x128xbf16>
    %78 = arith.extf %77 : vector<8x128xbf16> to vector<8x128xf32>
    %79 = vector.shape_cast %78 : vector<8x128xf32> to vector<1x8x128xf32>
    %80 = vector.broadcast %75 : vector<2x8x1xf32> to vector<2x8x128xf32>
    %81 = vector.broadcast %79 : vector<1x8x128xf32> to vector<2x8x128xf32>
    %82 = arith.mulf %80, %81 : vector<2x8x128xf32>
    %83 = arith.addf %74, %82 : vector<2x8x128xf32>
    %84 = vector.extract_strided_slice %29 {offsets = [0, 0, 6], sizes = [2, 8, 1], strides = [1, 1, 1]} : vector<2x8x7xf32> to vector<2x8x1xf32>
    %c6 = arith.constant 6 : index
    %c0_27 = arith.constant 0 : index
    %c0_28 = arith.constant 0 : index
    %85 = vector.load %arg6[%c6, %c0_27, %c0_28] : memref<7x8x128xbf16, #tpu.memory_space<vmem>>, vector<1x8x128xbf16>
    %86 = vector.shape_cast %85 : vector<1x8x128xbf16> to vector<8x128xbf16>
    %87 = arith.extf %86 : vector<8x128xbf16> to vector<8x128xf32>
    %88 = vector.shape_cast %87 : vector<8x128xf32> to vector<1x8x128xf32>
    %89 = vector.broadcast %84 : vector<2x8x1xf32> to vector<2x8x128xf32>
    %90 = vector.broadcast %88 : vector<1x8x128xf32> to vector<2x8x128xf32>
    %91 = arith.mulf %89, %90 : vector<2x8x128xf32>
    %92 = arith.addf %83, %91 : vector<2x8x128xf32>
    %93 = arith.truncf %92 : vector<2x8x128xf32> to vector<2x8x128xbf16>
    %94 = vector.shape_cast %93 : vector<2x8x128xbf16> to vector<2x8x2x64xbf16>
    %95 = tpu.transpose %94, [2, 1, 0, 3] : vector<2x8x2x64xbf16> -> vector<2x8x2x64xbf16>
    %96 = vector.shape_cast %95 : vector<2x8x2x64xbf16> to vector<2x8x128xbf16>
    %c0_29 = arith.constant 0 : index
    %c0_30 = arith.constant 0 : index
    %c0_31 = arith.constant 0 : index
    %97 = vector.load %arg4[%c0_29, %c0_30, %c0_31] : memref<2x8x8xbf16, #tpu.memory_space<vmem>>, vector<2x8x8xbf16>
    %cst_32 = arith.constant dense<0.000000e+00> : vector<2x8x128xf32>
    %98 = tpu.matmul %97, %96, %cst_32 {dimension_numbers = #tpu.dot_dimension_numbers<[2], [1], [1], [2], [0, 0, 0, 1, 1, 2], [0], [0]>} : vector<2x8x8xbf16>, vector<2x8x128xbf16>, vector<2x8x128xf32> -> vector<2x8x128xf32>
    %99 = vector.shape_cast %98 : vector<2x8x128xf32> to vector<2x8x2x64xf32>
    %100 = tpu.transpose %99, [2, 1, 0, 3] : vector<2x8x2x64xf32> -> vector<2x8x2x64xf32>
    %101 = vector.shape_cast %100 : vector<2x8x2x64xf32> to vector<2x8x128xf32>
    %c0_33 = arith.constant 0 : index
    %c0_34 = arith.constant 0 : index
    %102 = vector.load %arg5[%c0_33, %c0_34] : memref<8x128xf32, #tpu.memory_space<vmem>>, vector<8x128xf32>
    %103 = vector.shape_cast %102 : vector<8x128xf32> to vector<1x8x128xf32>
    %104 = vector.broadcast %103 : vector<1x8x128xf32> to vector<2x8x128xf32>
    %105 = arith.addf %101, %104 : vector<2x8x128xf32>
    %c0_35 = arith.constant 0 : index
    %c0_36 = arith.constant 0 : index
    %c0_37 = arith.constant 0 : index
    %106 = vector.load %arg10[%c0_35, %c0_36, %c0_37] : memref<2x8x128xf32, #tpu.memory_space<vmem>>, vector<2x8x128xf32>
    tpu.vector_store %arg10[%c0_35, %c0_36, %c0_37], %105 {strides = array<i32>} : memref<2x8x128xf32, #tpu.memory_space<vmem>>, vector<2x8x128xf32>,
    %c0_38 = arith.constant 0 : index
    %c0_39 = arith.constant 0 : index
    %c0_40 = arith.constant 0 : index
    %107 = vector.load %arg2[%c0_38, %c0_39, %c0_40] : memref<2x8x128xf32, #tpu.memory_space<vmem>>, vector<2x8x128xf32>
    %108 = arith.mulf %105, %107 : vector<2x8x128xf32>
    %c0_41 = arith.constant 0 : index
    %c0_42 = arith.constant 0 : index
    %c0_43 = arith.constant 0 : index
    %109 = vector.load %arg9[%c0_41, %c0_42, %c0_43] : memref<2x8x128xf32, #tpu.memory_space<vmem>>, vector<2x8x128xf32>
    tpu.vector_store %arg9[%c0_41, %c0_42, %c0_43], %108 {strides = array<i32>} : memref<2x8x128xf32, #tpu.memory_space<vmem>>, vector<2x8x128xf32>,
    return
  }
  func.func @transform_0(%arg0: i32) -> (i32, i32, i32) {
    %c0_i32 = arith.constant 0 : i32
    %c0_i32_0 = arith.constant 0 : i32
    %c0_i32_1 = arith.constant 0 : i32
    return %arg0, %c0_i32, %c0_i32_0 : i32, i32, i32
  }
  func.func @transform_1(%arg0: i32) -> (i32, i32, i32) {
    %c0_i32 = arith.constant 0 : i32
    %c0_i32_0 = arith.constant 0 : i32
    %c0_i32_1 = arith.constant 0 : i32
    return %arg0, %c0_i32, %c0_i32_0 : i32, i32, i32
  }
  func.func @transform_2(%arg0: i32) -> (i32, i32, i32) {
    %c0_i32 = arith.constant 0 : i32
    %c0_i32_0 = arith.constant 0 : i32
    %c0_i32_1 = arith.constant 0 : i32
    return %arg0, %c0_i32, %c0_i32_0 : i32, i32, i32
  }
  func.func @transform_3(%arg0: i32) -> (i32, i32, i32) {
    %c0_i32 = arith.constant 0 : i32
    %c0_i32_0 = arith.constant 0 : i32
    %c0_i32_1 = arith.constant 0 : i32
    %c0_i32_2 = arith.constant 0 : i32
    return %c0_i32, %c0_i32_0, %c0_i32_1 : i32, i32, i32
  }
  func.func @transform_4(%arg0: i32) -> (i32, i32) {
    %c0_i32 = arith.constant 0 : i32
    %c0_i32_0 = arith.constant 0 : i32
    %c0_i32_1 = arith.constant 0 : i32
    return %c0_i32, %c0_i32_0 : i32, i32
  }
  func.func @transform_5(%arg0: i32) -> (i32, i32, i32) {
    %c0_i32 = arith.constant 0 : i32
    %c0_i32_0 = arith.constant 0 : i32
    %c0_i32_1 = arith.constant 0 : i32
    %c0_i32_2 = arith.constant 0 : i32
    return %c0_i32, %c0_i32_0, %c0_i32_1 : i32, i32, i32
  }
  func.func @transform_6(%arg0: i32) -> (i32, i32) {
    %c0_i32 = arith.constant 0 : i32
    %c0_i32_0 = arith.constant 0 : i32
    %c0_i32_1 = arith.constant 0 : i32
    return %c0_i32, %c0_i32_0 : i32, i32
  }
  func.func @transform_7(%arg0: i32) -> (i32, i32) {
    %c0_i32 = arith.constant 0 : i32
    %c0_i32_0 = arith.constant 0 : i32
    %c0_i32_1 = arith.constant 0 : i32
    return %c0_i32, %c0_i32_0 : i32, i32
  }
  func.func @transform_8(%arg0: i32) -> (i32, i32, i32) {
    %c0_i32 = arith.constant 0 : i32
    %c0_i32_0 = arith.constant 0 : i32
    %c0_i32_1 = arith.constant 0 : i32
    return %arg0, %c0_i32, %c0_i32_0 : i32, i32, i32
  }
  func.func @transform_9(%arg0: i32) -> (i32, i32, i32) {
    %c0_i32 = arith.constant 0 : i32
    %c0_i32_0 = arith.constant 0 : i32
    %c0_i32_1 = arith.constant 0 : i32
    return %arg0, %c0_i32, %c0_i32_0 : i32, i32, i32
  }
}

module attributes {stable_mosaic.version = 11 : i64} {
  func.func @_sgu_kernel(%arg0: i32, %arg1: memref<2x8x128xf32, #tpu.memory_space<vmem>>, %arg2: memref<2x8x128xf32, #tpu.memory_space<vmem>>, %arg3: memref<2x8x7xf32, #tpu.memory_space<vmem>>, %arg4: memref<2x8x8xbf16, #tpu.memory_space<vmem>>, %arg5: memref<8x128xf32, #tpu.memory_space<vmem>>, %arg6: memref<7x8x128xbf16, #tpu.memory_space<vmem>>, %arg7: memref<1x128xf32, #tpu.memory_space<vmem>>, %arg8: memref<1x128xf32, #tpu.memory_space<vmem>>, %arg9: memref<2x8x128xf32, #tpu.memory_space<vmem>>, %arg10: memref<2x8x128xf32, #tpu.memory_space<vmem>>) attributes {dimension_semantics = [#tpu.dimension_semantics<parallel>], iteration_bounds = array<i64: 2>, scalar_prefetch = 0 : i64, scratch_operands = 0 : i64, tpu.core_type = #tpu.core_type<tc>, window_params = [{transform_indices = @transform_0, window_bounds = array<i64: 2, 8, 128>}, {transform_indices = @transform_1, window_bounds = array<i64: 2, 8, 128>}, {transform_indices = @transform_2, window_bounds = array<i64: 2, 8, 7>}, {pipeline_mode = #tpu.pipeline_mode<synchronous>, transform_indices = @transform_3, window_bounds = array<i64: 2, 8, 8>}, {pipeline_mode = #tpu.pipeline_mode<synchronous>, transform_indices = @transform_4, window_bounds = array<i64: 8, 128>}, {pipeline_mode = #tpu.pipeline_mode<synchronous>, transform_indices = @transform_5, window_bounds = array<i64: 7, 8, 128>}, {pipeline_mode = #tpu.pipeline_mode<synchronous>, transform_indices = @transform_6, window_bounds = array<i64: 1, 128>}, {pipeline_mode = #tpu.pipeline_mode<synchronous>, transform_indices = @transform_7, window_bounds = array<i64: 1, 128>}, {transform_indices = @transform_8, window_bounds = array<i64: 2, 8, 128>}, {transform_indices = @transform_9, window_bounds = array<i64: 2, 8, 128>}]} {
    %c0 = arith.constant 0 : index
    %c0_0 = arith.constant 0 : index
    %c0_1 = arith.constant 0 : index
    %0 = vector.load %arg1[%c0, %c0_0, %c0_1] : memref<2x8x128xf32, #tpu.memory_space<vmem>>, vector<2x8x128xf32>
    %cst = arith.constant dense<0.000000e+00> : vector<2x8xf32>
    %1 = vector.multi_reduction <add>, %0, %cst [2] : vector<2x8x128xf32> to vector<2x8xf32>
    %2 = vector.shape_cast %1 : vector<2x8xf32> to vector<2x8x1xf32>
    %cst_2 = arith.constant 1.280000e+02 : f32
    %3 = vector.broadcast %cst_2 : f32 to vector<2x8x1xf32>
    %4 = arith.divf %2, %3 : vector<2x8x1xf32>
    %5 = arith.mulf %0, %0 : vector<2x8x128xf32>
    %cst_3 = arith.constant dense<0.000000e+00> : vector<2x8xf32>
    %6 = vector.multi_reduction <add>, %5, %cst_3 [2] : vector<2x8x128xf32> to vector<2x8xf32>
    %7 = vector.shape_cast %6 : vector<2x8xf32> to vector<2x8x1xf32>
    %cst_4 = arith.constant 1.280000e+02 : f32
    %8 = vector.broadcast %cst_4 : f32 to vector<2x8x1xf32>
    %9 = arith.divf %7, %8 : vector<2x8x1xf32>
    %10 = arith.mulf %4, %4 : vector<2x8x1xf32>
    %11 = arith.subf %9, %10 : vector<2x8x1xf32>
    %12 = vector.broadcast %4 : vector<2x8x1xf32> to vector<2x8x128xf32>
    %13 = arith.subf %0, %12 : vector<2x8x128xf32>
    %cst_5 = arith.constant 9.99999974E-6 : f32
    %14 = vector.broadcast %cst_5 : f32 to vector<2x8x1xf32>
    %15 = arith.addf %11, %14 : vector<2x8x1xf32>
    %16 = math.rsqrt %15 : vector<2x8x1xf32>
    %17 = vector.broadcast %16 : vector<2x8x1xf32> to vector<2x8x128xf32>
    %18 = arith.mulf %13, %17 : vector<2x8x128xf32>
    %c0_6 = arith.constant 0 : index
    %c0_7 = arith.constant 0 : index
    %19 = vector.load %arg7[%c0_6, %c0_7] : memref<1x128xf32, #tpu.memory_space<vmem>>, vector<1x128xf32>
    %20 = vector.shape_cast %19 : vector<1x128xf32> to vector<1x1x128xf32>
    %21 = vector.broadcast %20 : vector<1x1x128xf32> to vector<2x8x128xf32>
    %22 = arith.mulf %18, %21 : vector<2x8x128xf32>
    %c0_8 = arith.constant 0 : index
    %c0_9 = arith.constant 0 : index
    %23 = vector.load %arg8[%c0_8, %c0_9] : memref<1x128xf32, #tpu.memory_space<vmem>>, vector<1x128xf32>
    %24 = vector.shape_cast %23 : vector<1x128xf32> to vector<1x1x128xf32>
    %25 = vector.broadcast %24 : vector<1x1x128xf32> to vector<2x8x128xf32>
    %26 = arith.addf %22, %25 : vector<2x8x128xf32>
    %c0_10 = arith.constant 0 : index
    %c0_11 = arith.constant 0 : index
    %c0_12 = arith.constant 0 : index
    %27 = vector.load %arg3[%c0_10, %c0_11, %c0_12] : memref<2x8x7xf32, #tpu.memory_space<vmem>>, vector<2x8x7xf32>
    %cst_13 = arith.constant 1.000000e+00 : f32
    %28 = vector.broadcast %cst_13 : f32 to vector<2x8x7xf32>
    %29 = arith.subf %28, %27 : vector<2x8x7xf32>
    %30 = vector.extract_strided_slice %29 {offsets = [0, 0, 0], sizes = [2, 8, 1], strides = [1, 1, 1]} : vector<2x8x7xf32> to vector<2x8x1xf32>
    %c0_14 = arith.constant 0 : index
    %c0_15 = arith.constant 0 : index
    %c0_16 = arith.constant 0 : index
    %31 = vector.load %arg6[%c0_14, %c0_15, %c0_16] : memref<7x8x128xbf16, #tpu.memory_space<vmem>>, vector<1x8x128xbf16>
    %32 = vector.shape_cast %31 : vector<1x8x128xbf16> to vector<8x128xbf16>
    %33 = arith.extf %32 : vector<8x128xbf16> to vector<8x128xf32>
    %34 = vector.shape_cast %33 : vector<8x128xf32> to vector<1x8x128xf32>
    %35 = vector.broadcast %30 : vector<2x8x1xf32> to vector<2x8x128xf32>
    %36 = vector.broadcast %34 : vector<1x8x128xf32> to vector<2x8x128xf32>
    %37 = arith.mulf %35, %36 : vector<2x8x128xf32>
    %38 = arith.addf %26, %37 : vector<2x8x128xf32>
    %39 = vector.extract_strided_slice %29 {offsets = [0, 0, 1], sizes = [2, 8, 1], strides = [1, 1, 1]} : vector<2x8x7xf32> to vector<2x8x1xf32>
    %c1 = arith.constant 1 : index
    %c0_17 = arith.constant 0 : index
    %c0_18 = arith.constant 0 : index
    %40 = vector.load %arg6[%c1, %c0_17, %c0_18] : memref<7x8x128xbf16, #tpu.memory_space<vmem>>, vector<1x8x128xbf16>
    %41 = vector.shape_cast %40 : vector<1x8x128xbf16> to vector<8x128xbf16>
    %42 = arith.extf %41 : vector<8x128xbf16> to vector<8x128xf32>
    %43 = vector.shape_cast %42 : vector<8x128xf32> to vector<1x8x128xf32>
    %44 = vector.broadcast %39 : vector<2x8x1xf32> to vector<2x8x128xf32>
    %45 = vector.broadcast %43 : vector<1x8x128xf32> to vector<2x8x128xf32>
    %46 = arith.mulf %44, %45 : vector<2x8x128xf32>
    %47 = arith.addf %38, %46 : vector<2x8x128xf32>
    %48 = vector.extract_strided_slice %29 {offsets = [0, 0, 2], sizes = [2, 8, 1], strides = [1, 1, 1]} : vector<2x8x7xf32> to vector<2x8x1xf32>
    %c2 = arith.constant 2 : index
    %c0_19 = arith.constant 0 : index
    %c0_20 = arith.constant 0 : index
    %49 = vector.load %arg6[%c2, %c0_19, %c0_20] : memref<7x8x128xbf16, #tpu.memory_space<vmem>>, vector<1x8x128xbf16>
    %50 = vector.shape_cast %49 : vector<1x8x128xbf16> to vector<8x128xbf16>
    %51 = arith.extf %50 : vector<8x128xbf16> to vector<8x128xf32>
    %52 = vector.shape_cast %51 : vector<8x128xf32> to vector<1x8x128xf32>
    %53 = vector.broadcast %48 : vector<2x8x1xf32> to vector<2x8x128xf32>
    %54 = vector.broadcast %52 : vector<1x8x128xf32> to vector<2x8x128xf32>
    %55 = arith.mulf %53, %54 : vector<2x8x128xf32>
    %56 = arith.addf %47, %55 : vector<2x8x128xf32>
    %57 = vector.extract_strided_slice %29 {offsets = [0, 0, 3], sizes = [2, 8, 1], strides = [1, 1, 1]} : vector<2x8x7xf32> to vector<2x8x1xf32>
    %c3 = arith.constant 3 : index
    %c0_21 = arith.constant 0 : index
    %c0_22 = arith.constant 0 : index
    %58 = vector.load %arg6[%c3, %c0_21, %c0_22] : memref<7x8x128xbf16, #tpu.memory_space<vmem>>, vector<1x8x128xbf16>
    %59 = vector.shape_cast %58 : vector<1x8x128xbf16> to vector<8x128xbf16>
    %60 = arith.extf %59 : vector<8x128xbf16> to vector<8x128xf32>
    %61 = vector.shape_cast %60 : vector<8x128xf32> to vector<1x8x128xf32>
    %62 = vector.broadcast %57 : vector<2x8x1xf32> to vector<2x8x128xf32>
    %63 = vector.broadcast %61 : vector<1x8x128xf32> to vector<2x8x128xf32>
    %64 = arith.mulf %62, %63 : vector<2x8x128xf32>
    %65 = arith.addf %56, %64 : vector<2x8x128xf32>
    %66 = vector.extract_strided_slice %29 {offsets = [0, 0, 4], sizes = [2, 8, 1], strides = [1, 1, 1]} : vector<2x8x7xf32> to vector<2x8x1xf32>
    %c4 = arith.constant 4 : index
    %c0_23 = arith.constant 0 : index
    %c0_24 = arith.constant 0 : index
    %67 = vector.load %arg6[%c4, %c0_23, %c0_24] : memref<7x8x128xbf16, #tpu.memory_space<vmem>>, vector<1x8x128xbf16>
    %68 = vector.shape_cast %67 : vector<1x8x128xbf16> to vector<8x128xbf16>
    %69 = arith.extf %68 : vector<8x128xbf16> to vector<8x128xf32>
    %70 = vector.shape_cast %69 : vector<8x128xf32> to vector<1x8x128xf32>
    %71 = vector.broadcast %66 : vector<2x8x1xf32> to vector<2x8x128xf32>
    %72 = vector.broadcast %70 : vector<1x8x128xf32> to vector<2x8x128xf32>
    %73 = arith.mulf %71, %72 : vector<2x8x128xf32>
    %74 = arith.addf %65, %73 : vector<2x8x128xf32>
    %75 = vector.extract_strided_slice %29 {offsets = [0, 0, 5], sizes = [2, 8, 1], strides = [1, 1, 1]} : vector<2x8x7xf32> to vector<2x8x1xf32>
    %c5 = arith.constant 5 : index
    %c0_25 = arith.constant 0 : index
    %c0_26 = arith.constant 0 : index
    %76 = vector.load %arg6[%c5, %c0_25, %c0_26] : memref<7x8x128xbf16, #tpu.memory_space<vmem>>, vector<1x8x128xbf16>
    %77 = vector.shape_cast %76 : vector<1x8x128xbf16> to vector<8x128xbf16>
    %78 = arith.extf %77 : vector<8x128xbf16> to vector<8x128xf32>
    %79 = vector.shape_cast %78 : vector<8x128xf32> to vector<1x8x128xf32>
    %80 = vector.broadcast %75 : vector<2x8x1xf32> to vector<2x8x128xf32>
    %81 = vector.broadcast %79 : vector<1x8x128xf32> to vector<2x8x128xf32>
    %82 = arith.mulf %80, %81 : vector<2x8x128xf32>
    %83 = arith.addf %74, %82 : vector<2x8x128xf32>
    %84 = vector.extract_strided_slice %29 {offsets = [0, 0, 6], sizes = [2, 8, 1], strides = [1, 1, 1]} : vector<2x8x7xf32> to vector<2x8x1xf32>
    %c6 = arith.constant 6 : index
    %c0_27 = arith.constant 0 : index
    %c0_28 = arith.constant 0 : index
    %85 = vector.load %arg6[%c6, %c0_27, %c0_28] : memref<7x8x128xbf16, #tpu.memory_space<vmem>>, vector<1x8x128xbf16>
    %86 = vector.shape_cast %85 : vector<1x8x128xbf16> to vector<8x128xbf16>
    %87 = arith.extf %86 : vector<8x128xbf16> to vector<8x128xf32>
    %88 = vector.shape_cast %87 : vector<8x128xf32> to vector<1x8x128xf32>
    %89 = vector.broadcast %84 : vector<2x8x1xf32> to vector<2x8x128xf32>
    %90 = vector.broadcast %88 : vector<1x8x128xf32> to vector<2x8x128xf32>
    %91 = arith.mulf %89, %90 : vector<2x8x128xf32>
    %92 = arith.addf %83, %91 : vector<2x8x128xf32>
    %93 = arith.truncf %92 : vector<2x8x128xf32> to vector<2x8x128xbf16>
    %94 = vector.shape_cast %93 : vector<2x8x128xbf16> to vector<2x8x2x64xbf16>
    %95 = tpu.transpose %94, [2, 1, 0, 3] : vector<2x8x2x64xbf16> -> vector<2x8x2x64xbf16>
    %96 = vector.shape_cast %95 : vector<2x8x2x64xbf16> to vector<2x8x128xbf16>
    %c0_29 = arith.constant 0 : index
    %c0_30 = arith.constant 0 : index
    %c0_31 = arith.constant 0 : index
    %97 = vector.load %arg4[%c0_29, %c0_30, %c0_31] : memref<2x8x8xbf16, #tpu.memory_space<vmem>>, vector<2x8x8xbf16>
    %cst_32 = arith.constant dense<0.000000e+00> : vector<2x8x128xf32>
    %98 = tpu.matmul %97, %96, %cst_32 {dimension_numbers = #tpu.dot_dimension_numbers<[2], [1], [1], [2], [0, 0, 0, 1, 1, 2], [0], [0]>} : vector<2x8x8xbf16>, vector<2x8x128xbf16>, vector<2x8x128xf32> -> vector<2x8x128xf32>
    %99 = vector.shape_cast %98 : vector<2x8x128xf32> to vector<2x8x2x64xf32>
    %100 = tpu.transpose %99, [2, 1, 0, 3] : vector<2x8x2x64xf32> -> vector<2x8x2x64xf32>
    %101 = vector.shape_cast %100 : vector<2x8x2x64xf32> to vector<2x8x128xf32>
    %c0_33 = arith.constant 0 : index
    %c0_34 = arith.constant 0 : index
    %102 = vector.load %arg5[%c0_33, %c0_34] : memref<8x128xf32, #tpu.memory_space<vmem>>, vector<8x128xf32>
    %103 = vector.shape_cast %102 : vector<8x128xf32> to vector<1x8x128xf32>
    %104 = vector.broadcast %103 : vector<1x8x128xf32> to vector<2x8x128xf32>
    %105 = arith.addf %101, %104 : vector<2x8x128xf32>
    %c0_35 = arith.constant 0 : index
    %c0_36 = arith.constant 0 : index
    %c0_37 = arith.constant 0 : index
    %106 = vector.load %arg10[%c0_35, %c0_36, %c0_37] : memref<2x8x128xf32, #tpu.memory_space<vmem>>, vector<2x8x128xf32>
    tpu.vector_store %arg10[%c0_35, %c0_36, %c0_37], %105 {strides = array<i32>} : memref<2x8x128xf32, #tpu.memory_space<vmem>>, vector<2x8x128xf32>,
    %c0_38 = arith.constant 0 : index
    %c0_39 = arith.constant 0 : index
    %c0_40 = arith.constant 0 : index
    %107 = vector.load %arg2[%c0_38, %c0_39, %c0_40] : memref<2x8x128xf32, #tpu.memory_space<vmem>>, vector<2x8x128xf32>
    %108 = arith.mulf %105, %107 : vector<2x8x128xf32>
    %c0_41 = arith.constant 0 : index
    %c0_42 = arith.constant 0 : index
    %c0_43 = arith.constant 0 : index
    %109 = vector.load %arg9[%c0_41, %c0_42, %c0_43] : memref<2x8x128xf32, #tpu.memory_space<vmem>>, vector<2x8x128xf32>
    tpu.vector_store %arg9[%c0_41, %c0_42, %c0_43], %108 {strides = array<i32>} : memref<2x8x128xf32, #tpu.memory_space<vmem>>, vector<2x8x128xf32>,
    return
  }
  func.func @transform_0(%arg0: i32) -> (i32, i32, i32) {
    %c0_i32 = arith.constant 0 : i32
    %c0_i32_0 = arith.constant 0 : i32
    %c0_i32_1 = arith.constant 0 : i32
    return %arg0, %c0_i32, %c0_i32_0 : i32, i32, i32
  }
  func.func @transform_1(%arg0: i32) -> (i32, i32, i32) {
    %c0_i32 = arith.constant 0 : i32
    %c0_i32_0 = arith.constant 0 : i32
    %c0_i32_1 = arith.constant 0 : i32
    return %arg0, %c0_i32, %c0_i32_0 : i32, i32, i32
  }
  func.func @transform_2(%arg0: i32) -> (i32, i32, i32) {
    %c0_i32 = arith.constant 0 : i32
    %c0_i32_0 = arith.constant 0 : i32
    %c0_i32_1 = arith.constant 0 : i32
    return %arg0, %c0_i32, %c0_i32_0 : i32, i32, i32
  }
  func.func @transform_3(%arg0: i32) -> (i32, i32, i32) {
    %c0_i32 = arith.constant 0 : i32
    %c0_i32_0 = arith.constant 0 : i32
    %c0_i32_1 = arith.constant 0 : i32
    %c0_i32_2 = arith.constant 0 : i32
    return %c0_i32, %c0_i32_0, %c0_i32_1 : i32, i32, i32
  }
  func.func @transform_4(%arg0: i32) -> (i32, i32) {
    %c0_i32 = arith.constant 0 : i32
    %c0_i32_0 = arith.constant 0 : i32
    %c0_i32_1 = arith.constant 0 : i32
    return %c0_i32, %c0_i32_0 : i32, i32
  }
  func.func @transform_5(%arg0: i32) -> (i32, i32, i32) {
    %c0_i32 = arith.constant 0 : i32
    %c0_i32_0 = arith.constant 0 : i32
    %c0_i32_1 = arith.constant 0 : i32
    %c0_i32_2 = arith.constant 0 : i32
    return %c0_i32, %c0_i32_0, %c0_i32_1 : i32, i32, i32
  }
  func.func @transform_6(%arg0: i32) -> (i32, i32) {
    %c0_i32 = arith.constant 0 : i32
    %c0_i32_0 = arith.constant 0 : i32
    %c0_i32_1 = arith.constant 0 : i32
    return %c0_i32, %c0_i32_0 : i32, i32
  }
  func.func @transform_7(%arg0: i32) -> (i32, i32) {
    %c0_i32 = arith.constant 0 : i32
    %c0_i32_0 = arith.constant 0 : i32
    %c0_i32_1 = arith.constant 0 : i32
    return %c0_i32, %c0_i32_0 : i32, i32
  }
  func.func @transform_8(%arg0: i32) -> (i32, i32, i32) {
    %c0_i32 = arith.constant 0 : i32
    %c0_i32_0 = arith.constant 0 : i32
    %c0_i32_1 = arith.constant 0 : i32
    return %arg0, %c0_i32, %c0_i32_0 : i32, i32, i32
  }
  func.func @transform_9(%arg0: i32) -> (i32, i32, i32) {
    %c0_i32 = arith.constant 0 : i32
    %c0_i32_0 = arith.constant 0 : i32
    %c0_i32_1 = arith.constant 0 : i32
    return %arg0, %c0_i32, %c0_i32_0 : i32, i32, i32
  }
}

</mosaic_0001>

<bundles_post_ra>
// kernel: tpu_custom_call.1
= control target key start
LH: loop header
LB: loop body
LE: loop exit
PB: predicated region body
PF: predicated region fallthrough
CT: control target
= control target key end

     0   :  { %15 = vsyncpa [#allocation3], 0  ;;  %s2297_s0 = inlined_call_operand.vmem [shape: f32[4,8,128], index: 0, kind: input, shape index: {}]   ;;  %s2298_s1 = inlined_call_operand.hbm [shape: f32[4,8,128], index: 1, kind: input, shape index: {}]   ;;  %s2299_s2 = inlined_call_operand.vmem [shape: f32[4,8,7], index: 2, kind: input, shape index: {}]   ;;  %s2300_s3 = inlined_call_operand.vmem [shape: bf16[2,8,8], index: 3, kind: input, shape index: {}]   ;;  %s2301_s4 = inlined_call_operand.hbm [shape: f32[8,128], index: 4, kind: input, shape index: {}]   ;;  %s2302_s5 = inlined_call_operand.vmem [shape: bf16[7,8,128], index: 5, kind: input, shape index: {}]   ;;  %s2303_s6 = inlined_call_operand.vmem [shape: f32[1,128], index: 6, kind: input, shape index: {}]   ;;  %s2304_s7 = inlined_call_operand.vmem [shape: f32[1,128], index: 7, kind: input, shape index: {}]   ;;  %s2305_s8 = inlined_call_operand.hbm [shape: f32[4,8,128], index: 8, kind: output, shape index: {0}]   ;;  %s2306_s9 = inlined_call_operand.hbm [shape: f32[4,8,128], index: 9, kind: output, shape index: {1}]  }
   0x1   :  { %17 = vsyncpa [#allocation3 + $0x1], 0 }
   0x2   :  { %18 = vsyncpa [#allocation6], 0 }
   0x3   :  { %19 = vsyncpa [#allocation4], 0 }
   0x4   :  { %21 = vsyncpa [#allocation4 + $0x1], 0 }
   0x5   :  { %22 = vsyncpa [#allocation9], 0 }
   0x6   :  { %24 = vsyncpa [#allocation9 + $0x1], 0  ;;  %s1903_s30 = smov 0   ;;  %s1905_s10 = smov 0  }
   0x7   :  { %s1907_s11 = smov 0   ;;  %s1909_s12 = smov 0  }
   0x8 LB: > { %2316 = sst [smem:[#allocation14_spill]] %s1827_s11  ;;  %s1924_s13 = sadd.s32 4294967295, %s1831_s12   ;;  %s1831_s12 = sphi %s1909_s12, %s2337_s12   ;;  %s1827_s11 = sphi %s1907_s11, %s2339_s11   ;;  %s1823_s10 = sphi %s1905_s10, %s2341_s10   ;;  %s1819_s30 = sphi %s1903_s30, %s2340_s30  }
   0x9   : > { %s1518_s14 = sadd.s32 4294967294, %s1831_s12   ;;  %s1928_s15 = sadd.s32 1, %s1831_s12  }
   0xa   : > { %2317 = sst [smem:[#allocation15_spill]] %s1928_s15  ;;  %s63_s16 = sadd.s32 1, %s1827_s11 }
   0xb   : > { %s60_s17 = ssub.s32 %s1831_s12, %s1928_s15  ;;  %p70_p0 = scmp.ne.s32.totalorder %s1827_s11, %s1823_s10 }
   0xc   : > { %p61_p1 = scmp.eq.s32.totalorder %s60_s17, 0  ;;  %p71_p2 = scmp.eq.s32.totalorder %s1831_s12, 0 }
   0xd   : > { %p76_p3 = scmp.ne.s32.totalorder %s1823_s10, %s1819_s30  ;;  %p2307_p4 = scmp.eq.s32.totalorder %s1924_s13, 0 }
   0xe   : > { %s1940_s18 = scalar_select %p61_p1, %s1827_s11, %s63_s16  }
   0xf   : > { %p1942_p5 = por %p71_p2, %p70_p0  ;;  %p1948_p6 = por %p2307_p4, %p76_p3 }
  0x10   : > { %2318 = sst [smem:[#allocation16_spill]] %s1940_s18  ;;  %p231_p7 = scmp.eq.s32.totalorder %s1924_s13, 1 }
  0x11   : > { %s2320_s20 = scalar_select %p1948_p6, 1, 0 }
  0x12   : > { %p237_p8 = scmp.eq.s32.totalorder %s1518_s14, 1  ;;  %p1519_p9 = scmp.ge.s32.totalorder %s1831_s12, 1 }
  0x13   : > { %p270_p10 = scmp.lt.s32.totalorder %s1831_s12, 3  ;;  %p1955_p11 = por %p231_p7, %p70_p0 }
  0x14   : > { %p1959_p12 = por %p237_p8, %p76_p3  ;;  %s1833_s24 = smov [#allocation5]  }
  0x15   : > { %s2321_s21 = scalar_select %p1955_p11, 1, 0 }
  0x16   : > { %s2322_s22 = scalar_select %p1959_p12, 1, 0 }
  0x17   : > { %p1963_p13 = pnand %p1519_p9, %p270_p10  ;;  %s286_s25 = sshll.u32 %s1833_s24, 4  ;;  %s287_s25 = int_to_ptr.vmem [resolvable:$true] %s286_s25 }
  0x18   : > { %2323 = sst [smem:[#allocation17_spill]] %s2322_s22  ;;  %p1605_p4 = scmp.lt.s32.totalorder %s1831_s12, 2 }
  0x19   : > { %s2324_s23 = scalar_select %p1963_p13, 1, 0 }
  0x1a   : > { %p1589_p2 = pneg %p1963_p13  ;;  %p2325_p0 = scmp.eq.s32.totalorder %s1924_s13, 0 }
  0x1b   : > { %s315_s27 = sand.u32 1, %s1827_s11   ;;  %p1980_p3 = pnand %p1605_p4, %p1942_p5 }
  0x1c   : > { %p1973_p7 = pnand %p1589_p2, %p2325_p0  ;;  %s1522_s29 = sshll.u32 %s315_s27, 4 }
  0x1d   : > { %s2327_s28 = scalar_select %p1980_p3, 1, 0 }
  0x1e   : > { %s1671_s17 = scalar_lea.hbm %s2301_s4, 128  ;;  %p1673_p9 = pneg %p1973_p7 }
  0x1f   : > { %p1672_p8 = scmp.ne.s32.totalorder %s2301_s4, %s1671_s17  ;;  %p1678_p4 = scmp.lt.u32.totalorder %s1671_s17, %s2301_s4 }
  0x21   : > { %p1674_p10 = pnand %p1673_p9, %p1672_p8 }
  0x23   : > { %p1675_p2 = pneg %p1674_p10 }
  0x25   : > { %p1680_p5 = pnand %p1678_p4, %p1675_p2 }
  0x27   : > { %1683 = shalt.err (!%p1680_p5)
}
  0x28   : > { %s1684_s19 = scalar_lea.vmem %s287_s25, 128  ;;  %p1692_p11 = scmp.lt.s32.totalorder %s287_s25, %s287_s25 }
  0x29   : > { %p1685_p0 = scmp.ne.s32.totalorder %s287_s25, %s1684_s19  ;;  %p1693_p6 = scmp.lt.s32.totalorder %s1684_s19, %s1684_s19 }
  0x2b   : > { %p1687_p1 = pnand %p1685_p0, %p1673_p9  ;;  %p1694_p13 = por %p1693_p6, %p1692_p11 }
  0x2d   : > { %p1688_p12 = pneg %p1687_p1 }
  0x2f   : > { %p1695_p3 = pnand %p1694_p13, %p1688_p12 }
  0x31   : > { %1698 = shalt.err (!%p1695_p3)
}
  0x32   : > { %1592 = dma.hbm_to_vmem [thread:$0]  (!%p1973_p7), %s2301_s4, 128, %s287_s25, [#allocation6]  }
  0x33   : > { %s1560_s11 = sshll.u32 %s1831_s12, 8  ;;  %s319_s15 = scalar_lea.vmem [#allocation2], %s1522_s29 }
  0x34   : > { %s326_s16 = sshll.u32 %s319_s15, 4  ;;  %s2004_s22 = scalar_lea.hbm %s2298_s1, %s1560_s11  ;;  %s2006_s16 = int_to_ptr.vmem [resolvable:$true] %s326_s16 }
  0x35   : > { %s2008_s26 = scalar_lea.sflag [#allocation3], %s315_s27  ;;  %s1699_s19 = scalar_lea.hbm %s2004_s22, 256 }
  0x36   : > { %p1700_p6 = scmp.ne.s32.totalorder %s2004_s22, %s1699_s19  ;;  %p2328_p11 = scmp.ne.s32.totalorder %s2327_s28, 0 }
  0x37   : > { %s1704_s18 = scalar_lea.hbm %s2298_s1, 512  ;;  %p1705_p7 = scmp.lt.u32.totalorder %s2004_s22, %s2298_s1 }
  0x38   : > { %p1701_p12 = pneg %p2328_p11  ;;  %p1706_p3 = scmp.lt.u32.totalorder %s1704_s18, %s1699_s19 }
  0x39   : > { %p1708_p9 = scmp.lt.u32.totalorder %s1699_s19, %s2004_s22 }
  0x3a   : > { %p1702_p13 = pnand %p1701_p12, %p1700_p6  ;;  %p1707_p8 = por %p1706_p3, %p1705_p7 }
  0x3c   : > { %p1703_p1 = pneg %p1702_p13  ;;  %p1709_p10 = por %p1708_p9, %p1707_p8 }
  0x3e   : > { %p1710_p2 = pnand %p1709_p10, %p1703_p1 }
  0x40   : > { %1713 = shalt.err (!%p1710_p2)
}
  0x41   : > { %s1714_s27 = scalar_lea.vmem %s2006_s16, 256  ;;  %s1834_s15 = smov [#allocation2]  }
  0x42   : > { %p1715_p4 = scmp.ne.s32.totalorder %s2006_s16, %s1714_s27  ;;  %s1719_s17 = sshll.u32 %s1834_s15, 4  ;;  %s1720_s17 = int_to_ptr.vmem [resolvable:$false] %s1719_s17 }
  0x43   : > { %s1721_s24 = scalar_lea.vmem %s1720_s17, 512  ;;  %p1722_p6 = scmp.lt.s32.totalorder %s2006_s16, %s1720_s17 }
  0x44   : > { %p1717_p5 = pnand %p1715_p4, %p1701_p12  ;;  %p1723_p13 = scmp.lt.s32.totalorder %s1721_s24, %s1714_s27 }
  0x46   : > { %p1718_p0 = pneg %p1717_p5  ;;  %p1724_p7 = por %p1723_p13, %p1722_p6 }
  0x48   : > { %p1725_p3 = pnand %p1724_p7, %p1718_p0 }
  0x4a   : > { %1728 = shalt.err (!%p1725_p3)
}
  0x4b   : > { %s1835_s19 = smov 128   ;;  %s1836_s25 = smov 8  }
  0x4c   : > { %1596 = dma.hbm_to_vmem [thread:$0]  (!%p2328_p11), %s2004_s22, 256, %s2006_s16, %s2008_s26, %s1835_s19, %s1835_s19, %s1836_s25  }
  0x4d   : > { %p2329_p12 = scmp.ne.s32.totalorder %s2324_s23, 0 }
  0x4e   : > { %s2039_s29 = sand.u32 (!%p2329_p12), 1, %s1823_s10   ;;  %p2330_p1 = scmp.ne.s32.totalorder (!%p2329_p12), %s2320_s20, 0 }
  0x4f   : > { %347 = sbr.rel (%p2329_p12) target bundleno = 1072 (0x430), region = 52  ;;  %s2042_s18 = sshll.u32 (!%p2329_p12), %s2039_s29, 4 }
  0x50   : > { %s350_s14 = scalar_lea.sflag (!%p2329_p12), [#allocation3], %s2039_s29  ;;  %s353_s11 = scalar_lea.vmem (!%p2329_p12), [#allocation2], %s2042_s18 }
  0x56   : > { %1802 = dma.done.wait (%p2330_p1), %s350_s14, 256  }
  0x57   : > { %1804 = vsyncadd (%p2330_p1), %s350_s14, 4294967040  ;;  %p2331_p11 = scmp.eq.s32.totalorder %s1924_s13, 0 }
  0x59   : > { %1806 = dma.done.wait (%p2331_p11), [#allocation6], 128   ;;  %p2332_p8 = pmov %p2331_p11 }
  0x5a   : > { %s1530_s22 = sshll.u32 %s1924_s13, 1  ;;  %v1837_v0 = vmov 0   ;;  %v1838_v9 = vmov 1   ;;  %v1839_v10 = vmov 4   ;;  %v1840_v11 = vmov 6   ;;  %v474_v39 = vld [vmem:[%s2302_s5] sm:$0xff]  }
  0x5b   : > { %1808 = vsyncadd (%p2332_p8), [#allocation6], 4294967168  ;;  %p408_p9 = scmp.lt.s32.totalorder %s1530_s22, 3  ;;  %1658 = vset.pattern.permute.xlu1 %v1837_v0  ;;  %1657 = vset.pattern.permute.xlu0 %v1837_v0  ;;  %v1841_v12 = vmov 2   ;;  %v1842_v13 = vmov 3   ;;  %v1843_v14 = vmov 5   ;;  %v475_v45 = vunpack.c.l.bf16 %v474_v39 }
  0x5c   : > { %v1534_v37 = vld [vmem:[%s2303_s6] ss:$0 sm:$0xff]  ;;  %v492_v50 = vunpack.c.h.bf16 %v474_v39  ;;  %v1537_v51 = vld [vmem:[%s2302_s5 + $0x8] sm:$0xff]   ;;  %v1539_v59 = vld [vmem:[%s2302_s5 + $0x10] sm:$0xff]   ;;  %vm1848_vm0 = vmmov 0   ;;  %vm910_vm1 = vcmask 523264  }
  0x5d   : > { %s2343_s22 = smov (!%p408_p9, %s1530_s22), 3  ;;  %v1535_v43 = vld [vmem:[%s2304_s7] ss:$0 sm:$0xff]  ;;  %v507_v56 = vunpack.c.l.bf16 %v1537_v51  ;;  %v522_v57 = vunpack.c.h.bf16 %v1537_v51  ;;  %v1541_v63 = vld [vmem:[%s2302_s5 + $0x18] sm:$0xf]  ;;  %vm923_vm2 = vcmask 1043456  }
  0x5e   : > { %s1531_s23 = sshll.u32 %s2343_s22, 3  ;;  %vm919_vm3 = vcmask 64512   ;;  %s406_s14 = scalar_lea.vmem [#allocation8], %s2042_s18 }
  0x5f   : > { %s411_s20 = scalar_lea.vmem %s2297_s0, %s1531_s23  ;;  %s418_s15 = scalar_lea.vmem %s2299_s2, %s1531_s23 }
  0x60   : > { %v2060_v1 = vld [vmem:[%s411_s20] sm:$0xff]  ;;  %v2065_v3 = vld [vmem:[%s411_s20 + $0x8] sm:$0xff]  ;;  %s1379_s22 = sshll.u32 %s406_s14, 4  ;;  %s1561_s23 = sshll.u32 %s1924_s13, 8  ;;  %s2205_s22 = int_to_ptr.vmem [resolvable:$true] %s1379_s22 }
  0x61   : > { %425 = vadd.xlane.f32.xlu0 %v2060_v1  ;;  %v432_v2 = vmul.f32 %v2060_v1, %v2060_v1  ;;  %v433_v4 = vmul.f32 %v2065_v3, %v2065_v3  ;;  %v471_v5 = vld [vmem:[%s418_s15 + $0x8] sm:$0xff]  ;;  %v470_v7 = vld [vmem:[%s418_s15] sm:$0xff]  ;;  %s1844_s15 = smov 64   ;;  %s2202_s28 = scalar_lea.vmem [#allocation7], %s2042_s18 }
  0x62   : > { %v473_v6 = vsub.f32 1.0, %v471_v5  ;;  %v472_v8 = vsub.f32 1.0, %v470_v7  ;;  %s1363_s16 = sshll.u32 %s2202_s28, 4  ;;  %s2214_s26 = scalar_lea.hbm %s2306_s9, %s1561_s23  ;;  %s2216_s16 = int_to_ptr.vmem [resolvable:$true] %s1363_s16 }
  0x63   : > { %434 = vadd.xlane.f32.xlu1 %v432_v2  ;;  %s2221_s18 = scalar_lea.hbm %s2305_s8, %s1561_s23  ;;  %s1729_s17 = scalar_lea.vmem %s2205_s22, 256 }
  0x64   : > { %p1730_p10 = scmp.ne.s32.totalorder %s2205_s22, %s1729_s17  ;;  %p2333_p2 = scmp.ne.s32.totalorder %s2321_s21, 0 }
  0x65   : > { %427 = vadd.xlane.f32.xlu0 %v2065_v3  ;;  %s1849_s24 = smov [#allocation8]  }
  0x66   : > { %p1731_p4 = pnand %p1730_p10, %p2333_p2  ;;  %s1733_s19 = sshll.u32 %s1849_s24, 4  ;;  %s1734_s19 = int_to_ptr.vmem [resolvable:$false] %s1733_s19 }
  0x67   : > { %436 = vadd.xlane.f32.xlu1 %v433_v4  ;;  %s1735_s25 = scalar_lea.vmem %s1734_s19, 512  ;;  %p1736_p0 = scmp.lt.s32.totalorder %s2205_s22, %s1734_s19 }
  0x68   : > { %p1732_p5 = pneg %p1731_p4  ;;  %p1737_p6 = scmp.lt.s32.totalorder %s1735_s25, %s1729_s17 }
  0x6a   : > { %p1738_p13 = por %p1737_p6, %p1736_p0 }
  0x6c   : > { %p1739_p7 = pnand %p1738_p13, %p1732_p5 }
  0x78   : > { %483 = vperm.xlu1 %1658, %v473_v6  }
  0x7b   : > { %478 = vperm.xlu0 %1657, %v472_v8  }
  0x7c   : > { %1659 = vset.pattern.permute.xlu1 %v1838_v9  ;;  %v567_v9 = vunpack.c.l.bf16 %v1541_v63 }
  0x7d   : > { %494 = vperm.xlu1 %1659, %v472_v8  }
  0x7f   : > { %1663 = vset.pattern.permute.xlu0 %v1839_v10 }
  0x80   : > { %543 = vperm.xlu0 %1663, %v473_v6  }
  0x81   : > { %498 = vperm.xlu1 %1659, %v473_v6  }
  0x84   : > { %1665 = vset.pattern.permute.xlu0 %v1840_v11 }
  0x85   : > { %1660 = vset.pattern.permute.xlu1 %v1841_v12  ;;  %569 = vperm.xlu0 %1665, %v472_v8  }
  0x86   : > { %509 = vperm.xlu1 %1660, %v472_v8  }
  0x8a   : > { %513 = vperm.xlu1 %1660, %v473_v6  }
  0x8e   : > { %1661 = vset.pattern.permute.xlu1 %v1842_v13 }
  0x8f   : > { %524 = vperm.xlu1 %1661, %v472_v8  }
  0x93   : > { %528 = vperm.xlu1 %1661, %v473_v6  }
  0x97   : > { %1662 = vset.pattern.permute.xlu1 %v1839_v10 }
  0x98   : > { %539 = vperm.xlu1 %1662, %v472_v8  }
  0x9c   : > { %1664 = vset.pattern.permute.xlu1 %v1843_v14 }
  0x9d   : > { %554 = vperm.xlu1 %1664, %v472_v8   ;;  %v552_v8 = vunpack.c.h.bf16 %v1539_v59 }
  0xa1   : > { %558 = vperm.xlu1 %1664, %v473_v6  }
  0xa5   : > { %1666 = vset.pattern.permute.xlu1 %v1840_v11 }
  0xa6   : > { %573 = vperm.xlu1 %1666, %v473_v6  }
  0xee   : > { %v426_v15 = vpop.xlane.xlu0 %425 }
  0xef   : > { %v430_v16 = vmul.f32 0.0078125, %v426_v15 }
  0xf0   : > { %v435_v17 = vpop.xlane.xlu1 %434 }
  0xf1   : > { %v440_v18 = vmul.f32 %v430_v16, %v430_v16  ;;  %v438_v19 = vmul.f32 0.0078125, %v435_v17  ;;  %v444_v32 = vsub.f32 %v2060_v1, %v430_v16 }
  0xf2   : > { %v428_v20 = vpop.xlane.xlu0 %427 }
  0xf3   : > { %v442_v21 = vsub.f32 %v438_v19, %v440_v18  ;;  %v431_v22 = vmul.f32 0.0078125, %v428_v20 }
  0xf4   : > { %v437_v23 = vpop.xlane.xlu1 %436 }
  0xf5   : > { %v446_v24 = vadd.f32 1e-05, %v442_v21  ;;  %v441_v25 = vmul.f32 %v431_v22, %v431_v22  ;;  %v439_v26 = vmul.f32 0.0078125, %v437_v23  ;;  %v445_v36 = vsub.f32 %v2065_v3, %v431_v22 }
  0xf6   : > { %v537_v3 = vunpack.c.l.bf16 %v1539_v59 }
  0xf7   : > { %v443_v27 = vsub.f32 %v439_v26, %v441_v25  ;;  %1667 = vrsqrt.f32 %v446_v24 }
  0xf8   : > { %v484_v28 = vpop.permute.xlu1 %483 }
  0xf9   : > { %v447_v29 = vadd.f32 1e-05, %v443_v27  ;;  %v487_v58 = vmul.f32 %v484_v28, %v475_v45 }
  0xfa   : > { %v479_v44 = vpop.permute.xlu0 %478 }
  0xfb   : > { %1669 = vrsqrt.f32 %v447_v29  ;;  %v486_v47 = vmul.f32 %v479_v44, %v475_v45 }
  0xfc   : > { %v495_v30 = vpop.permute.xlu1 %494 }
  0xfd   : > { %v501_v55 = vmul.f32 %v495_v30, %v492_v50 }
  0xff   : > { %v544_v62 = vpop.permute.xlu0 %543 }
 0x100   : > { %v499_v31 = vpop.permute.xlu1 %498  ;;  %v547_v22 = vmul.f32 %v544_v62, %v537_v3 }
 0x101   : > { %v1668_v33 = vpop.eup %1667  ;;  %v502_v5 = vmul.f32 %v499_v31, %v492_v50 }
 0x102   : > { %v450_v34 = vmul.f32 %v1668_v33, %v444_v32  ;;  %v1845_v33 = vmov 1983009808  }
 0x104   : > { %v459_v40 = vmul.f32 %v1534_v37, %v450_v34  ;;  %v570_v11 = vpop.permute.xlu0 %569  ;;  %v589_v34 = vunpack.c.l.s4 %v1845_v33 }
 0x105   : > { %v510_v35 = vpop.permute.xlu1 %509  ;;  %v1670_v38 = vpop.eup %1669  ;;  %v576_v18 = vmul.f32 %v570_v11, %v567_v9 }
 0x106   : > { %v451_v42 = vmul.f32 %v1670_v38, %v445_v36  ;;  %v468_v46 = vadd.f32 %v1535_v43, %v459_v40  ;;  %v516_v1 = vmul.f32 %v510_v35, %v507_v56  ;;  %v591_v35 = vlaneseq }
 0x107   : > { %v590_v36 = vunpack.c.0.s8 %v589_v34  ;;  %v1846_v38 = vmov 1934713408  }
 0x108   : > { %v460_v48 = vmul.f32 %v1534_v37, %v451_v42  ;;  %v488_v52 = vadd.f32 %v486_v47, %v468_v46  ;;  %v592_v37 = vshrl.u32 %v591_v35, 7  ;;  %v597_v39 = vunpack.c.l.s4 %v1846_v38 }
 0x109   : > { %v514_v41 = vpop.permute.xlu1 %513 }
 0x10a   : > { %v469_v53 = vadd.f32 %v1535_v43, %v460_v48  ;;  %v503_v60 = vadd.f32 %v501_v55, %v488_v52  ;;  %v517_v13 = vmul.f32 %v514_v41, %v507_v56  ;;  %v2095_v40 = vsub.s32 %v590_v36, %v592_v37 }
 0x10b   : > { %v598_v41 = vunpack.c.0.s8 %v597_v39 }
 0x10c   : > { %v489_v61 = vadd.f32 %v487_v58, %v469_v53  ;;  %v518_v6 = vadd.f32 %v516_v1, %v503_v60 }
 0x10d   : > { %v2098_v43 = vsub.s32 %v598_v41, %v592_v37 }
 0x10e   : > { %v525_v49 = vpop.permute.xlu1 %524  ;;  %v504_v10 = vadd.f32 %v502_v5, %v489_v61 }
 0x10f   : > { %v531_v2 = vmul.f32 %v525_v49, %v522_v57 }
 0x110   : > { %v519_v19 = vadd.f32 %v517_v13, %v504_v10 }
 0x111   : > { %v533_v12 = vadd.f32 %v531_v2, %v518_v6 }
 0x112   : > { %v529_v54 = vpop.permute.xlu1 %528 }
 0x113   : > { %v532_v14 = vmul.f32 %v529_v54, %v522_v57 }
 0x115   : > { %v534_v21 = vadd.f32 %v532_v14, %v519_v19 }
 0x117   : > { %v540_v4 = vpop.permute.xlu1 %539  ;;  %v549_v27 = vadd.f32 %v547_v22, %v534_v21 }
 0x118   : > { %v546_v7 = vmul.f32 %v540_v4, %v537_v3 }
 0x11a   : > { %v548_v16 = vadd.f32 %v546_v7, %v533_v12 }
 0x11c   : > { %v555_v15 = vpop.permute.xlu1 %554 }
 0x11d   : > { %v561_v17 = vmul.f32 %v555_v15, %v552_v8 }
 0x11f   : > { %v563_v20 = vadd.f32 %v561_v17, %v548_v16 }
 0x120   : > { %v559_v23 = vpop.permute.xlu1 %558 }
 0x121   : > { %v578_v24 = vadd.f32 %v576_v18, %v563_v20  ;;  %v562_v25 = vmul.f32 %v559_v23, %v552_v8 }
 0x123   : > { %v580_v26 = vpack.c.bf16 %v578_v24, %v578_v24  ;;  %v564_v29 = vadd.f32 %v562_v25, %v549_v27 }
 0x125   : > { %584 = vrot.lane.b32.xlu1 %v580_v26, %s1844_s15  ;;  %v574_v28 = vpop.permute.xlu1 %573  ;;  %v594_v42 = vrot.slane %v580_v26, %v2095_v40 }
 0x126   : > { %v577_v30 = vmul.f32 %v574_v28, %v567_v9 }
 0x127   : > { %v595_v44 = vcombine.high %v594_v42, %v1837_v0  ;;  %v602_v46 = vrot.slane %v594_v42, %v2098_v43 }
 0x128   : > { %v579_v31 = vadd.f32 %v577_v30, %v564_v29 }
 0x129   : > { %v609_v47 = vrot.slane %v595_v44, %v2098_v43  ;;  %v610_v50 = vcombine.high %v602_v46, %v1837_v0  ;;  %v689_v57 = vshrl.u32 %v602_v46, 16 }
 0x12a   : > { %v581_v32 = vpack.c.bf16 %v579_v31, %v579_v31 }
 0x12b   : > { %v611_v54 = vcombine.high %v609_v47, %v1837_v0  ;;  %v695_v58 = vshrl.u32 %v610_v50, 16  ;;  %v701_v60 = vshrl.u32 %v609_v47, 16 }
 0x12c   : > { %586 = vrot.lane.b32.xlu0 %v581_v32, %s1844_s15  ;;  %v643_v45 = vrot.slane %v581_v32, %v2095_v40 }
 0x12d   : > { %v707_v1 = vshrl.u32 %v611_v54, 16 }
 0x12e   : > { %v644_v48 = vcombine.high %v643_v45, %v1837_v0  ;;  %v651_v49 = vrot.slane %v643_v45, %v2098_v43 }
 0x130   : > { %v658_v53 = vrot.slane %v644_v48, %v2098_v43  ;;  %v659_v59 = vcombine.high %v651_v49, %v1837_v0  ;;  %v713_v4 = vshrl.u32 %v651_v49, 16 }
 0x132   : > { %v660_v3 = vcombine.high %v658_v53, %v1837_v0  ;;  %v719_v13 = vshrl.u32 %v659_v59, 16  ;;  %v725_v17 = vshrl.u32 %v658_v53, 16 }
 0x134   : > { %v731_v21 = vshrl.u32 %v660_v3, 16 }
 0x197   : > { %v585_v51 = vpop.permute.xlu1 %584 }
 0x198   : > { %v619_v52 = vrot.slane %v585_v51, %v2095_v40 }
 0x19a   : > { %v620_v55 = vcombine.high %v619_v52, %v1837_v0  ;;  %v627_v56 = vrot.slane %v619_v52, %v2098_v43 }
 0x19c   : > { %v634_v61 = vrot.slane %v620_v55, %v2098_v43  ;;  %v635_v62 = vcombine.high %v627_v56, %v1837_v0  ;;  %v690_v63 = vshrl.u32 %v627_v56, 16  ;;  %v2115_v2 = vpack.i.b16 %v627_v56, %v602_v46 }
 0x19e   : > { %v636_v5 = vcombine.high %v634_v61, %v1837_v0  ;;  %v2119_v6 = vpack.i.b16 %v690_v63, %v689_v57  ;;  %v2121_v7 = vpack.i.b16 %v635_v62, %v610_v50  ;;  %v696_v8 = vshrl.u32 %v635_v62, 16  ;;  %v587_v9 = vpop.permute.xlu0 %586 }
 0x19f   : > { %v700_v10 = vpack.i.b16 %v634_v61, %v609_v47  ;;  %v702_v11 = vshrl.u32 %v634_v61, 16  ;;  %v668_v12 = vrot.slane %v587_v9, %v2095_v40  ;;  %v738_v19 = vshrl.u32 %v2115_v2, 16 }
 0x1a0   : > { %v697_v14 = vpack.i.b16 %v696_v8, %v695_v58  ;;  %v706_v15 = vpack.i.b16 %v636_v5, %v611_v54  ;;  %v708_v16 = vshrl.u32 %v636_v5, 16  ;;  %v746_v23 = vshrl.u32 %v2119_v6, 16 }
 0x1a1   : > { %v703_v18 = vpack.i.b16 %v702_v11, %v701_v60  ;;  %v669_v20 = vcombine.high %v668_v12, %v1837_v0  ;;  %v754_v24 = vshrl.u32 %v2121_v7, 16  ;;  %v676_v25 = vrot.slane %v668_v12, %v2098_v43 }
 0x1a2   : > { %v709_v22 = vpack.i.b16 %v708_v16, %v707_v1  ;;  %v762_v26 = vshrl.u32 %v697_v14, 16  ;;  %v770_v27 = vshrl.u32 %v700_v10, 16  ;;  %v786_v28 = vshrl.u32 %v706_v15, 16 }
 0x1a3   : > { %v683_v29 = vrot.slane %v669_v20, %v2098_v43  ;;  %v778_v30 = vshrl.u32 %v703_v18, 16  ;;  %v684_v31 = vcombine.high %v676_v25, %v1837_v0  ;;  %v712_v32 = vpack.i.b16 %v676_v25, %v651_v49 }
 0x1a4   : > { %v714_v33 = vshrl.u32 %v676_v25, 16  ;;  %v794_v34 = vshrl.u32 %v709_v22, 16 }
 0x1a5   : > { %v685_v35 = vcombine.high %v683_v29, %v1837_v0  ;;  %v724_v36 = vpack.i.b16 %v683_v29, %v658_v53  ;;  %v726_v37 = vshrl.u32 %v683_v29, 16  ;;  %v718_v39 = vpack.i.b16 %v684_v31, %v659_v59 }
 0x1a6   : > { %v715_v38 = vpack.i.b16 %v714_v33, %v713_v4  ;;  %v720_v41 = vshrl.u32 %v684_v31, 16  ;;  %v736_v42 = vpack.i.b16 %v712_v32, %v2115_v2  ;;  %v739_v47 = vshrl.u32 %v712_v32, 16 }
 0x1a7   : > { %v727_v44 = vpack.i.b16 %v726_v37, %v725_v17  ;;  %v730_v45 = vpack.i.b16 %v685_v35, %v660_v3  ;;  %v732_v46 = vshrl.u32 %v685_v35, 16  ;;  %v752_v49 = vpack.i.b16 %v718_v39, %v2121_v7 }
 0x1a8   : > { %v721_v48 = vpack.i.b16 %v720_v41, %v719_v13  ;;  %v744_v50 = vpack.i.b16 %v715_v38, %v2119_v6  ;;  %v747_v51 = vshrl.u32 %v715_v38, 16  ;;  %v740_v54 = vpack.i.b16 %v739_v47, %v738_v19  ;;  %v917_v47 = vld [vmem:[%s2300_s3] sm:$0xf] }
 0x1a9   : > { %v733_v52 = vpack.i.b16 %v732_v46, %v731_v21  ;;  %v755_v0 = vshrl.u32 %v718_v39, 16  ;;  %v768_v53 = vpack.i.b16 %v724_v36, %v700_v10  ;;  %v771_v58 = vshrl.u32 %v724_v36, 16 }
 0x1aa   : > { %v748_v55 = vpack.i.b16 %v747_v51, %v746_v23  ;;  %v760_v56 = vpack.i.b16 %v721_v48, %v697_v14  ;;  %v763_v57 = vshrl.u32 %v721_v48, 16  ;;  %v776_v60 = vpack.i.b16 %v727_v44, %v703_v18  ;;  %v918_v51 = vld [vmem:[%s2300_s3 + $0x4] sm:$0xf] }
 0x1ab   : > { %v756_v59 = vpack.i.b16 %v755_v0, %v754_v24  ;;  %v779_v61 = vshrl.u32 %v727_v44, 16  ;;  %v784_v62 = vpack.i.b16 %v730_v45, %v706_v15  ;;  %v772_v1 = vpack.i.b16 %v771_v58, %v770_v27 }
 0x1ac   : > { %v764_v63 = vpack.i.b16 %v763_v57, %v762_v26  ;;  %v787_v2 = vshrl.u32 %v730_v45, 16  ;;  %v792_v3 = vpack.i.b16 %v733_v52, %v709_v22  ;;  %v795_v5 = vshrl.u32 %v733_v52, 16 }
 0x1ad   : > { %v780_v4 = vpack.i.b16 %v779_v61, %v778_v30  ;;  %v798_v6 = vcombine.low %v736_v42, %v768_v53  ;;  %v806_v7 = vcombine.low %v752_v49, %v784_v62  ;;  %v822_v9 = vcombine.low %v744_v50, %v776_v60 }
 0x1ae   : > { %v788_v8 = vpack.i.b16 %v787_v2, %v786_v28  ;;  %v846_v11 = vcombine.low %v740_v54, %v772_v1  ;;  %v830_v10 = vcombine.low %v760_v56, %v792_v3  ;;  %v796_v14 = vpack.i.b16 %v795_v5, %v794_v34 }
 0x1af   : > { %v805_v12 = vrot.slane %v798_v6, %v2095_v40  ;;  %v813_v13 = vrot.slane %v806_v7, %v2095_v40  ;;  %v870_v16 = vcombine.low %v748_v55, %v780_v4  ;;  %v829_v15 = vrot.slane %v822_v9, %v2095_v40 }
 0x1b0   : > { %v837_v17 = vrot.slane %v830_v10, %v2095_v40  ;;  %v854_v18 = vcombine.low %v756_v59, %v788_v8  ;;  %v878_v20 = vcombine.low %v764_v63, %v796_v14  ;;  %v853_v22 = vrot.slane %v846_v11, %v2095_v40 }
 0x1b1   : > { %v814_v19 = vcombine.low %v805_v12, %v813_v13  ;;  %v1847_v24 = vmov 0.0   ;;  %v877_v26 = vrot.slane %v870_v16, %v2095_v40 }
 0x1b2   : > { %v838_v21 = vcombine.low %v829_v15, %v837_v17  ;;  %v861_v23 = vrot.slane %v854_v18, %v2095_v40  ;;  %1567 = vmatprep.subr.bf16.mxu0 %v1847_v24  ;;  %1573 = vmatprep.subr.bf16.mxu1 %v1847_v24  ;;  %v885_v27 = vrot.slane %v878_v20, %v2095_v40 }
 0x1b3   : > { %v821_v25 = vrot.slane %v814_v19, %v2098_v43  ;;  %1569 = vmatprep.mubr.msk.bf16.mxu0 %vm1848_vm0, %v1847_v24  ;;  %1575 = vmatprep.mubr.msk.bf16.mxu1 %vm1848_vm0, %v1847_v24 }
 0x1b4   : > { %v845_v28 = vrot.slane %v838_v21, %v2098_v43  ;;  %v862_v29 = vcombine.low %v853_v22, %v861_v23  ;;  %v886_v30 = vcombine.low %v877_v26, %v885_v27 }
 0x1b5   : > { %v897_v31 = vshrl.u32 %v821_v25, 16 }
 0x1b6   : > { %v898_v32 = vshrl.u32 %v845_v28, 16  ;;  %v869_v33 = vrot.slane %v862_v29, %v2098_v43  ;;  %v896_v34 = vpack.i.b16 %v845_v28, %v821_v25  ;;  %v893_v35 = vrot.slane %v886_v30, %v2098_v43 }
 0x1b8   : > { %v899_v36 = vpack.i.b16 %v898_v32, %v897_v31  ;;  %v903_v37 = vshrl.u32 %v869_v33, 16  ;;  %v904_v38 = vshrl.u32 %v893_v35, 16  ;;  %v902_v39 = vpack.i.b16 %v893_v35, %v869_v33 }
 0x1ba   : > { %906 = vrot.lane.b32.xlu1 %v899_v36, %s1844_s15  ;;  %v905_v41 = vpack.i.b16 %v904_v38, %v903_v37 }
 0x1bc   : > { %908 = vrot.lane.b32.xlu0 %v905_v41, %s1844_s15 }
 0x22c   : > { %v907_v42 = vpop.permute.xlu1 %906 }
 0x22d   : > { %v913_v44 = vsel %vm910_vm1, %v896_v34, %v907_v42 }
 0x22e   : > { %v924_v45 = vsel %vm923_vm2, %v913_v44, 0  ;;  %v909_v46 = vpop.permute.xlu0 %908 }
 0x22f   : > { %1568 = vmatpush3.bf16.msra.mxu0 %v924_v45  ;;  %v916_v48 = vsel %vm910_vm1, %v902_v39, %v909_v46 }
 0x230   : > { %v969_v50 = vsel %vm923_vm2, %v916_v48, 0 }
 0x231   : > { %1574 = vmatpush3.bf16.msra.mxu1 %v969_v50 }
 0x232   : > { %1570 = vmatmul.mubr.msk.bf16.vlgmr.msra.gmra.mrb[0].mxu0 %vm919_vm3, %v917_v47 }
 0x234   : > { %1576 = vmatmul.mubr.msk.bf16.vlgmr.msra.gmra.mrb[0].mxu1 %vm919_vm3, %v918_v51 }
 0x305   : > { %v960_v49 = vpop.f32.mrb[0].mxu0 }
 0x306   : > { %1013 = vrot.lane.b32.xlu1 %v960_v49, %s1844_s15  ;;  %v1571_v52 = vpop.f32.mrb[1].mxu0  ;;  %v1019_v58 = vcombine.high %v960_v49, %v1847_v24  ;;  %v1026_v60 = vrot.slane %v960_v49, %v2095_v40 }
 0x307   : > { %v963_v54 = vpop.f32.mrb[2].mxu0  ;;  %v1005_v0 = vpop.f32.mrb[0].mxu1 }
 0x308   : > { %v1572_v53 = vpop.f32.mrb[3].mxu0  ;;  %1015 = vrot.lane.b32.xlu0 %v1005_v0, %s1844_s15  ;;  %v1577_v55 = vpop.f32.mrb[1].mxu1  ;;  %v1081_v63 = vcombine.high %v1005_v0, %v1847_v24  ;;  %v1033_v1 = vrot.slane %v1019_v58, %v2095_v40  ;;  %v1088_v5 = vrot.slane %v1005_v0, %v2095_v40 }
 0x309   : > { %v1008_v56 = vpop.f32.mrb[2].mxu1 }
 0x30a   : > { %v1578_v57 = vpop.f32.mrb[3].mxu1  ;;  %v1095_v11 = vrot.slane %v1081_v63, %v2095_v40 }
 0x378   : > { %v1014_v59 = vpop.permute.xlu1 %1013 }
 0x379   : > { %v1034_v61 = vcombine.high %v1014_v59, %v1847_v24  ;;  %v1041_v62 = vrot.slane %v1014_v59, %v2095_v40 }
 0x37a   : > { %v1016_v4 = vpop.permute.xlu0 %1015 }
 0x37b   : > { %v1048_v2 = vrot.slane %v1034_v61, %v2095_v40  ;;  %v1049_v3 = vcombine.low %v1026_v60, %v1041_v62  ;;  %v1096_v6 = vcombine.high %v1016_v4, %v1847_v24  ;;  %v1103_v7 = vrot.slane %v1016_v4, %v2095_v40 }
 0x37c   : > { %v1050_v8 = vcombine.high %v1026_v60, %v1041_v62 }
 0x37d   : > { %v1065_v9 = vcombine.low %v1033_v1, %v1048_v2  ;;  %v1110_v10 = vrot.slane %v1096_v6, %v2095_v40  ;;  %v1111_v12 = vcombine.low %v1088_v5, %v1103_v7  ;;  %v1112_v13 = vcombine.high %v1088_v5, %v1103_v7 }
 0x37e   : > { %v1057_v14 = vrot.slane %v1049_v3, %v2098_v43  ;;  %v1066_v16 = vcombine.high %v1033_v1, %v1048_v2  ;;  %v1064_v20 = vrot.slane %v1050_v8, %v2098_v43  ;;  %v1339_v8 = vld [vmem:[%s353_s11 + $0x8] sm:$0xff] }
 0x37f   : > { %v1119_v15 = vrot.slane %v1111_v12, %v2098_v43  ;;  %v1126_v17 = vrot.slane %v1112_v13, %v2098_v43  ;;  %v1127_v18 = vcombine.low %v1095_v11, %v1110_v10  ;;  %v1128_v19 = vcombine.high %v1095_v11, %v1110_v10  ;;  %v1338_v10 = vld [vmem:[%s353_s11] sm:$0xff]  ;;  %s1350_s11 = scalar_lea.sflag [#allocation9], %s2039_s29 }
 0x380   : > { %v1073_v21 = vrot.slane %v1065_v9, %v2098_v43  ;;  %v1080_v26 = vrot.slane %v1066_v16, %v2098_v43 }
 0x381   : > { %v1135_v22 = vrot.slane %v1127_v18, %v2098_v43  ;;  %v1142_v23 = vrot.slane %v1128_v19, %v2098_v43  ;;  %v1143_v24 = vcombine.low %v1057_v14, %v1119_v15  ;;  %v1544_v25 = vcombine.high %v1057_v14, %v1119_v15 }
 0x382   : > { %v1163_v27 = vcombine.low %v1064_v20, %v1126_v17  ;;  %v1545_v28 = vcombine.high %v1064_v20, %v1126_v17 }
 0x383   : > { %v1150_v29 = vrot.slane %v1143_v24, %v2098_v43  ;;  %v1161_v30 = vrot.slane %v1544_v25, %v2098_v43  ;;  %v1183_v31 = vcombine.low %v1073_v21, %v1135_v22  ;;  %v1546_v32 = vcombine.high %v1073_v21, %v1135_v22 }
 0x384   : > { %v1170_v33 = vrot.slane %v1163_v27, %v2098_v43  ;;  %v1181_v34 = vrot.slane %v1545_v28, %v2098_v43  ;;  %v1203_v35 = vcombine.low %v1080_v26, %v1142_v23  ;;  %v1547_v36 = vcombine.high %v1080_v26, %v1142_v23 }
 0x385   : > { %v1190_v37 = vrot.slane %v1183_v31, %v2098_v43  ;;  %v1201_v38 = vrot.slane %v1546_v32, %v2098_v43 }
 0x386   : > { %v1210_v39 = vrot.slane %v1203_v35, %v2098_v43  ;;  %v1221_v41 = vrot.slane %v1547_v36, %v2098_v43  ;;  %v1223_v42 = vcombine.low %v1150_v29, %v1170_v33  ;;  %v1231_v44 = vcombine.low %v1161_v30, %v1181_v34 }
 0x387   : > { %v1548_v45 = vcombine.high %v1150_v29, %v1170_v33  ;;  %v1549_v46 = vcombine.high %v1161_v30, %v1181_v34 }
 0x388   : > { %v1550_v47 = vcombine.high %v1190_v37, %v1210_v39  ;;  %v1551_v48 = vcombine.high %v1201_v38, %v1221_v41  ;;  %v1230_v50 = vrot.slane %v1223_v42, %v2095_v40  ;;  %v1238_v51 = vrot.slane %v1231_v44, %v2095_v40 }
 0x389   : > { %v1280_v49 = vrot.slane %v1548_v45, %v2095_v40  ;;  %v1288_v52 = vrot.slane %v1549_v46, %v2095_v40  ;;  %v1239_v54 = vcombine.low %v1190_v37, %v1210_v39  ;;  %v1247_v0 = vcombine.low %v1201_v38, %v1221_v41 }
 0x38a   : > { %v1296_v53 = vrot.slane %v1550_v47, %v2095_v40  ;;  %v1304_v55 = vrot.slane %v1551_v48, %v2095_v40  ;;  %v1255_v56 = vcombine.low %v1230_v50, %v1238_v51 }
 0x38b   : > { %v1305_v57 = vcombine.low %v1280_v49, %v1288_v52  ;;  %v1246_v58 = vrot.slane %v1239_v54, %v2095_v40  ;;  %v1254_v59 = vrot.slane %v1247_v0, %v2095_v40  ;;  %v1333_v40 = vld [vmem:[#allocation5] sm:$0xff] }
 0x38c   : > { %v1313_v60 = vcombine.low %v1296_v53, %v1304_v55  ;;  %v1262_v1 = vrot.slane %v1255_v56, %v2098_v43 }
 0x38d   : > { %v1263_v61 = vcombine.low %v1246_v58, %v1254_v59  ;;  %v1312_v62 = vrot.slane %v1305_v57, %v2098_v43 }
 0x38e   : > { %v1320_v63 = vrot.slane %v1313_v60, %v2098_v43 }
 0x38f   : > { %v1270_v2 = vrot.slane %v1263_v61, %v2098_v43 }
 0x390   : > { %v1322_v3 = vcombine.high %v1312_v62, %v1320_v63  ;;  %v1321_v4 = vcombine.low %v1312_v62, %v1320_v63 }
 0x391   : > { %v1272_v5 = vcombine.high %v1262_v1, %v1270_v2  ;;  %v1271_v6 = vcombine.low %v1262_v1, %v1270_v2 }
 0x392   : > { %1327 = vrot.lane.b32.xlu0 %v1322_v3, %s1844_s15 }
 0x393   : > { %1325 = vrot.lane.b32.xlu1 %v1272_v5, %s1844_s15 }
 0x404   : > { %v1328_v7 = vpop.permute.xlu0 %1327 }
 0x405   : > { %v1332_v43 = vsel %vm910_vm1, %v1321_v4, %v1328_v7  ;;  %v1326_v9 = vpop.permute.xlu1 %1325 }
 0x406   : > { %v1335_v11 = vadd.f32 %v1333_v40, %v1332_v43  ;;  %v1331_v12 = vsel %vm910_vm1, %v1271_v6, %v1326_v9 }
 0x407   : > { %v1334_v13 = vadd.f32 %v1333_v40, %v1331_v12 }
 0x408   : > { %1337 = vst [vmem:[%s406_s14 + $0x8] sm:$0xff] %v1335_v11  ;;  %v1341_v14 = vmul.f32 %v1339_v8, %v1335_v11 }
 0x409   : > { %1336 = vst [vmem:[%s406_s14] sm:$0xff] %v1334_v13  ;;  %v1340_v16 = vmul.f32 %v1338_v10, %v1334_v13 }
 0x40a   : > { %1343 = vst [vmem:[%s2202_s28 + $0x8] sm:$0xff] %v1341_v14 }
 0x40b   : > { %1742 = shalt.err (!%p1739_p7)
}
 0x40c   : > { %s1743_s14 = scalar_lea.hbm %s2214_s26, 256  ;;  %s1747_s20 = scalar_lea.hbm %s2306_s9, 512 }
 0x40d   : > { %p1744_p3 = scmp.ne.s32.totalorder %s2214_s26, %s1743_s14  ;;  %p1748_p11 = scmp.lt.u32.totalorder %s2214_s26, %s2306_s9 }
 0x40e   : > { %p1749_p8 = scmp.lt.u32.totalorder %s1747_s20, %s1743_s14  ;;  %p1751_p10 = scmp.lt.u32.totalorder %s1743_s14, %s2214_s26 }
 0x40f   : > { %p1745_p12 = pnand %p1744_p3, %p2333_p2 }
 0x410   : > { %p1750_p9 = por %p1749_p8, %p1748_p11 }
 0x411   : > { %p1746_p1 = pneg %p1745_p12 }
 0x412   : > { %p1752_p4 = por %p1751_p10, %p1750_p9 }
 0x414   : > { %p1753_p5 = pnand %p1752_p4, %p1746_p1 }
 0x416   : > { %1756 = shalt.err (!%p1753_p5)
}
 0x417   : > { %s1850_s17 = smov 128   ;;  %s1851_s24 = smov 8   ;;  %1342 = vst [vmem:[%s2202_s28] sm:$0xff] %v1340_v16 }
 0x418   : > { %1586 = dma.vmem_to_hbm [thread:$0]  (%p2333_p2), %s2205_s22, 256, %s2214_s26, %s1350_s11, %s1850_s17, %s1850_s17, %s1851_s24  }
 0x419   : > { %s1345_s19 = scalar_lea.sflag [#allocation4], %s2039_s29  ;;  %s1757_s25 = scalar_lea.vmem %s2216_s16, 256 }
 0x41a   : > { %p1758_p0 = scmp.ne.s32.totalorder %s2216_s16, %s1757_s25  ;;  %s1852_s14 = smov [#allocation7]  }
 0x41b   : > { %s1761_s23 = sshll.u32 %s1852_s14, 4  ;;  %s1762_s23 = int_to_ptr.vmem [resolvable:$false] %s1761_s23 }
 0x41c   : > { %p1759_p6 = pnand %p1758_p0, %p2333_p2  ;;  %s1763_s13 = scalar_lea.vmem %s1762_s23, 512 }
 0x41d   : > { %p1764_p7 = scmp.lt.s32.totalorder %s2216_s16, %s1762_s23  ;;  %p1765_p3 = scmp.lt.s32.totalorder %s1763_s13, %s1757_s25 }
 0x41e   : > { %p1760_p13 = pneg %p1759_p6 }
 0x41f   : > { %p1766_p12 = por %p1765_p3, %p1764_p7 }
 0x421   : > { %p1767_p1 = pnand %p1766_p12, %p1760_p13 }
 0x423   : > { %1770 = shalt.err (!%p1767_p1)
}
 0x424   : > { %s1771_s22 = scalar_lea.hbm %s2221_s18, 256  ;;  %s1775_s11 = scalar_lea.hbm %s2305_s8, 512 }
 0x425   : > { %p1772_p11 = scmp.ne.s32.totalorder %s2221_s18, %s1771_s22  ;;  %p1776_p10 = scmp.lt.u32.totalorder %s2221_s18, %s2305_s8 }
 0x426   : > { %p1777_p4 = scmp.lt.u32.totalorder %s1775_s11, %s1771_s22  ;;  %p1779_p0 = scmp.lt.u32.totalorder %s1771_s22, %s2221_s18 }
 0x427   : > { %p1773_p8 = pnand %p1772_p11, %p2333_p2 }
 0x428   : > { %p1778_p5 = por %p1777_p4, %p1776_p10 }
 0x429   : > { %p1774_p9 = pneg %p1773_p8 }
 0x42a   : > { %p1780_p6 = por %p1779_p0, %p1778_p5 }
 0x42c   : > { %p1781_p13 = pnand %p1780_p6, %p1774_p9 }
 0x42e   : > { %1784 = shalt.err (!%p1781_p13)
}
 0x42f   : > { %1585 = dma.vmem_to_hbm [thread:$0]  (%p2333_p2), %s2216_s16, 256, %s2221_s18, %s1345_s19, %s1850_s17, %s1850_s17, %s1851_s24  }
 0x430 PF: > { %s2334_s15 = sld [smem:[#allocation17_spill]]  ;;  %s1394_s25 = sand.u32 1, %s1819_s30  }
 0x431   : > { %p2336_p3 = scmp.ge.s32.totalorder %s1831_s12, 2  ;;  %s1395_s14 = scalar_lea.sflag [#allocation4], %s1394_s25 }
 0x436   : > { %p2335_p7 = scmp.ne.s32.totalorder %s2334_s15, 0 }
 0x438   : > { %p1598_p12 = pnand %p2336_p3, %p2335_p7 }
 0x43a   : > { %1810 = dma.done.wait (!%p1598_p12), %s1395_s14, 256  }
 0x43b   : > { %1812 = vsyncadd (!%p1598_p12), %s1395_s14, 4294967040  ;;  %s1404_s21 = scalar_lea.sflag [#allocation9], %s1394_s25 }
 0x43c   : > { %1814 = dma.done.wait (!%p1598_p12), %s1404_s21, 256  }
 0x43d   : > { %1816 = vsyncadd (!%p1598_p12), %s1404_s21, 4294967040  ;;  %s2337_s12 = sld [smem:[#allocation15_spill]]  ;;  %s2338_s29 = sld [smem:[#allocation14_spill]] }
 0x43e   : > { %s2339_s11 = sld [smem:[#allocation16_spill]]  ;;  %s2340_s30 = smov %s1823_s10 }
 0x443   : > { %p27_p2 = scmp.ge.s32.totalorder %s2337_s12, 4   ;;  %s2341_s10 = smov %s2338_s29 }
 0x445   :  { %29 = sbr.rel (!%p27_p2) target bundleno = 8 (0x8), region = 130 }
 0x44c   :  { %1409 = vsyncpa [#allocation3], 1 }
 0x44d   :  { %1411 = vsyncpa [#allocation3 + $0x1], 1 }
 0x44e   :  { %1412 = vsyncpa [#allocation6], 1 }
 0x44f   :  { %1413 = vsyncpa [#allocation4], 1 }
 0x450   :  { %1415 = vsyncpa [#allocation4 + $0x1], 1 }
 0x451   :  { %1416 = vsyncpa [#allocation9], 1 }
 0x452   :  { %1418 = vsyncpa [#allocation9 + $0x1], 1 }

// kernel: tpu_custom_call.1
= control target key start
LH: loop header
LB: loop body
LE: loop exit
PB: predicated region body
PF: predicated region fallthrough
CT: control target
= control target key end

     0   :  { %15 = vsyncpa [#allocation3], 0  ;;  %s2297_s0 = inlined_call_operand.vmem [shape: f32[4,8,128], index: 0, kind: input, shape index: {}]   ;;  %s2298_s1 = inlined_call_operand.hbm [shape: f32[4,8,128], index: 1, kind: input, shape index: {}]   ;;  %s2299_s2 = inlined_call_operand.vmem [shape: f32[4,8,7], index: 2, kind: input, shape index: {}]   ;;  %s2300_s3 = inlined_call_operand.vmem [shape: bf16[2,8,8], index: 3, kind: input, shape index: {}]   ;;  %s2301_s4 = inlined_call_operand.hbm [shape: f32[8,128], index: 4, kind: input, shape index: {}]   ;;  %s2302_s5 = inlined_call_operand.vmem [shape: bf16[7,8,128], index: 5, kind: input, shape index: {}]   ;;  %s2303_s6 = inlined_call_operand.vmem [shape: f32[1,128], index: 6, kind: input, shape index: {}]   ;;  %s2304_s7 = inlined_call_operand.vmem [shape: f32[1,128], index: 7, kind: input, shape index: {}]   ;;  %s2305_s8 = inlined_call_operand.hbm [shape: f32[4,8,128], index: 8, kind: output, shape index: {0}]   ;;  %s2306_s9 = inlined_call_operand.hbm [shape: f32[4,8,128], index: 9, kind: output, shape index: {1}]  }
   0x1   :  { %17 = vsyncpa [#allocation3 + $0x1], 0 }
   0x2   :  { %18 = vsyncpa [#allocation6], 0 }
   0x3   :  { %19 = vsyncpa [#allocation4], 0 }
   0x4   :  { %21 = vsyncpa [#allocation4 + $0x1], 0 }
   0x5   :  { %22 = vsyncpa [#allocation9], 0 }
   0x6   :  { %24 = vsyncpa [#allocation9 + $0x1], 0  ;;  %s1903_s30 = smov 0   ;;  %s1905_s10 = smov 0  }
   0x7   :  { %s1907_s11 = smov 0   ;;  %s1909_s12 = smov 0  }
   0x8 LB: > { %2316 = sst [smem:[#allocation14_spill]] %s1827_s11  ;;  %s1924_s13 = sadd.s32 4294967295, %s1831_s12   ;;  %s1831_s12 = sphi %s1909_s12, %s2337_s12   ;;  %s1827_s11 = sphi %s1907_s11, %s2339_s11   ;;  %s1823_s10 = sphi %s1905_s10, %s2341_s10   ;;  %s1819_s30 = sphi %s1903_s30, %s2340_s30  }
   0x9   : > { %s1518_s14 = sadd.s32 4294967294, %s1831_s12   ;;  %s1928_s15 = sadd.s32 1, %s1831_s12  }
   0xa   : > { %2317 = sst [smem:[#allocation15_spill]] %s1928_s15  ;;  %s63_s16 = sadd.s32 1, %s1827_s11 }
   0xb   : > { %s60_s17 = ssub.s32 %s1831_s12, %s1928_s15  ;;  %p70_p0 = scmp.ne.s32.totalorder %s1827_s11, %s1823_s10 }
   0xc   : > { %p61_p1 = scmp.eq.s32.totalorder %s60_s17, 0  ;;  %p71_p2 = scmp.eq.s32.totalorder %s1831_s12, 0 }
   0xd   : > { %p76_p3 = scmp.ne.s32.totalorder %s1823_s10, %s1819_s30  ;;  %p2307_p4 = scmp.eq.s32.totalorder %s1924_s13, 0 }
   0xe   : > { %s1940_s18 = scalar_select %p61_p1, %s1827_s11, %s63_s16  }
   0xf   : > { %p1942_p5 = por %p71_p2, %p70_p0  ;;  %p1948_p6 = por %p2307_p4, %p76_p3 }
  0x10   : > { %2318 = sst [smem:[#allocation16_spill]] %s1940_s18  ;;  %p231_p7 = scmp.eq.s32.totalorder %s1924_s13, 1 }
  0x11   : > { %s2320_s20 = scalar_select %p1948_p6, 1, 0 }
  0x12   : > { %p237_p8 = scmp.eq.s32.totalorder %s1518_s14, 1  ;;  %p1519_p9 = scmp.ge.s32.totalorder %s1831_s12, 1 }
  0x13   : > { %p270_p10 = scmp.lt.s32.totalorder %s1831_s12, 3  ;;  %p1955_p11 = por %p231_p7, %p70_p0 }
  0x14   : > { %p1959_p12 = por %p237_p8, %p76_p3  ;;  %s1833_s24 = smov [#allocation5]  }
  0x15   : > { %s2321_s21 = scalar_select %p1955_p11, 1, 0 }
  0x16   : > { %s2322_s22 = scalar_select %p1959_p12, 1, 0 }
  0x17   : > { %p1963_p13 = pnand %p1519_p9, %p270_p10  ;;  %s286_s25 = sshll.u32 %s1833_s24, 4  ;;  %s287_s25 = int_to_ptr.vmem [resolvable:$true] %s286_s25 }
  0x18   : > { %2323 = sst [smem:[#allocation17_spill]] %s2322_s22  ;;  %p1605_p4 = scmp.lt.s32.totalorder %s1831_s12, 2 }
  0x19   : > { %s2324_s23 = scalar_select %p1963_p13, 1, 0 }
  0x1a   : > { %p1589_p2 = pneg %p1963_p13  ;;  %p2325_p0 = scmp.eq.s32.totalorder %s1924_s13, 0 }
  0x1b   : > { %s315_s27 = sand.u32 1, %s1827_s11   ;;  %p1980_p3 = pnand %p1605_p4, %p1942_p5 }
  0x1c   : > { %p1973_p7 = pnand %p1589_p2, %p2325_p0  ;;  %s1522_s29 = sshll.u32 %s315_s27, 4 }
  0x1d   : > { %s2327_s28 = scalar_select %p1980_p3, 1, 0 }
  0x1e   : > { %s1671_s17 = scalar_lea.hbm %s2301_s4, 128  ;;  %p1673_p9 = pneg %p1973_p7 }
  0x1f   : > { %p1672_p8 = scmp.ne.s32.totalorder %s2301_s4, %s1671_s17  ;;  %p1678_p4 = scmp.lt.u32.totalorder %s1671_s17, %s2301_s4 }
  0x21   : > { %p1674_p10 = pnand %p1673_p9, %p1672_p8 }
  0x23   : > { %p1675_p2 = pneg %p1674_p10 }
  0x25   : > { %p1680_p5 = pnand %p1678_p4, %p1675_p2 }
  0x27   : > { %1683 = shalt.err (!%p1680_p5)
}
  0x28   : > { %s1684_s19 = scalar_lea.vmem %s287_s25, 128  ;;  %p1692_p11 = scmp.lt.s32.totalorder %s287_s25, %s287_s25 }
  0x29   : > { %p1685_p0 = scmp.ne.s32.totalorder %s287_s25, %s1684_s19  ;;  %p1693_p6 = scmp.lt.s32.totalorder %s1684_s19, %s1684_s19 }
  0x2b   : > { %p1687_p1 = pnand %p1685_p0, %p1673_p9  ;;  %p1694_p13 = por %p1693_p6, %p1692_p11 }
  0x2d   : > { %p1688_p12 = pneg %p1687_p1 }
  0x2f   : > { %p1695_p3 = pnand %p1694_p13, %p1688_p12 }
  0x31   : > { %1698 = shalt.err (!%p1695_p3)
}
  0x32   : > { %1592 = dma.hbm_to_vmem [thread:$0]  (!%p1973_p7), %s2301_s4, 128, %s287_s25, [#allocation6]  }
  0x33   : > { %s1560_s11 = sshll.u32 %s1831_s12, 8  ;;  %s319_s15 = scalar_lea.vmem [#allocation2], %s1522_s29 }
  0x34   : > { %s326_s16 = sshll.u32 %s319_s15, 4  ;;  %s2004_s22 = scalar_lea.hbm %s2298_s1, %s1560_s11  ;;  %s2006_s16 = int_to_ptr.vmem [resolvable:$true] %s326_s16 }
  0x35   : > { %s2008_s26 = scalar_lea.sflag [#allocation3], %s315_s27  ;;  %s1699_s19 = scalar_lea.hbm %s2004_s22, 256 }
  0x36   : > { %p1700_p6 = scmp.ne.s32.totalorder %s2004_s22, %s1699_s19  ;;  %p2328_p11 = scmp.ne.s32.totalorder %s2327_s28, 0 }
  0x37   : > { %s1704_s18 = scalar_lea.hbm %s2298_s1, 512  ;;  %p1705_p7 = scmp.lt.u32.totalorder %s2004_s22, %s2298_s1 }
  0x38   : > { %p1701_p12 = pneg %p2328_p11  ;;  %p1706_p3 = scmp.lt.u32.totalorder %s1704_s18, %s1699_s19 }
  0x39   : > { %p1708_p9 = scmp.lt.u32.totalorder %s1699_s19, %s2004_s22 }
  0x3a   : > { %p1702_p13 = pnand %p1701_p12, %p1700_p6  ;;  %p1707_p8 = por %p1706_p3, %p1705_p7 }
  0x3c   : > { %p1703_p1 = pneg %p1702_p13  ;;  %p1709_p10 = por %p1708_p9, %p1707_p8 }
  0x3e   : > { %p1710_p2 = pnand %p1709_p10, %p1703_p1 }
  0x40   : > { %1713 = shalt.err (!%p1710_p2)
}
  0x41   : > { %s1714_s27 = scalar_lea.vmem %s2006_s16, 256  ;;  %s1834_s15 = smov [#allocation2]  }
  0x42   : > { %p1715_p4 = scmp.ne.s32.totalorder %s2006_s16, %s1714_s27  ;;  %s1719_s17 = sshll.u32 %s1834_s15, 4  ;;  %s1720_s17 = int_to_ptr.vmem [resolvable:$false] %s1719_s17 }
  0x43   : > { %s1721_s24 = scalar_lea.vmem %s1720_s17, 512  ;;  %p1722_p6 = scmp.lt.s32.totalorder %s2006_s16, %s1720_s17 }
  0x44   : > { %p1717_p5 = pnand %p1715_p4, %p1701_p12  ;;  %p1723_p13 = scmp.lt.s32.totalorder %s1721_s24, %s1714_s27 }
  0x46   : > { %p1718_p0 = pneg %p1717_p5  ;;  %p1724_p7 = por %p1723_p13, %p1722_p6 }
  0x48   : > { %p1725_p3 = pnand %p1724_p7, %p1718_p0 }
  0x4a   : > { %1728 = shalt.err (!%p1725_p3)
}
  0x4b   : > { %s1835_s19 = smov 128   ;;  %s1836_s25 = smov 8  }
  0x4c   : > { %1596 = dma.hbm_to_vmem [thread:$0]  (!%p2328_p11), %s2004_s22, 256, %s2006_s16, %s2008_s26, %s1835_s19, %s1835_s19, %s1836_s25  }
  0x4d   : > { %p2329_p12 = scmp.ne.s32.totalorder %s2324_s23, 0 }
  0x4e   : > { %s2039_s29 = sand.u32 (!%p2329_p12), 1, %s1823_s10   ;;  %p2330_p1 = scmp.ne.s32.totalorder (!%p2329_p12), %s2320_s20, 0 }
  0x4f   : > { %347 = sbr.rel (%p2329_p12) target bundleno = 1072 (0x430), region = 52  ;;  %s2042_s18 = sshll.u32 (!%p2329_p12), %s2039_s29, 4 }
  0x50   : > { %s350_s14 = scalar_lea.sflag (!%p2329_p12), [#allocation3], %s2039_s29  ;;  %s353_s11 = scalar_lea.vmem (!%p2329_p12), [#allocation2], %s2042_s18 }
  0x56   : > { %1802 = dma.done.wait (%p2330_p1), %s350_s14, 256  }
  0x57   : > { %1804 = vsyncadd (%p2330_p1), %s350_s14, 4294967040  ;;  %p2331_p11 = scmp.eq.s32.totalorder %s1924_s13, 0 }
  0x59   : > { %1806 = dma.done.wait (%p2331_p11), [#allocation6], 128   ;;  %p2332_p8 = pmov %p2331_p11 }
  0x5a   : > { %s1530_s22 = sshll.u32 %s1924_s13, 1  ;;  %v1837_v0 = vmov 0   ;;  %v1838_v9 = vmov 1   ;;  %v1839_v10 = vmov 4   ;;  %v1840_v11 = vmov 6   ;;  %v474_v39 = vld [vmem:[%s2302_s5] sm:$0xff]  }
  0x5b   : > { %1808 = vsyncadd (%p2332_p8), [#allocation6], 4294967168  ;;  %p408_p9 = scmp.lt.s32.totalorder %s1530_s22, 3  ;;  %1658 = vset.pattern.permute.xlu1 %v1837_v0  ;;  %1657 = vset.pattern.permute.xlu0 %v1837_v0  ;;  %v1841_v12 = vmov 2   ;;  %v1842_v13 = vmov 3   ;;  %v1843_v14 = vmov 5   ;;  %v475_v45 = vunpack.c.l.bf16 %v474_v39 }
  0x5c   : > { %v1534_v37 = vld [vmem:[%s2303_s6] ss:$0 sm:$0xff]  ;;  %v492_v50 = vunpack.c.h.bf16 %v474_v39  ;;  %v1537_v51 = vld [vmem:[%s2302_s5 + $0x8] sm:$0xff]   ;;  %v1539_v59 = vld [vmem:[%s2302_s5 + $0x10] sm:$0xff]   ;;  %vm1848_vm0 = vmmov 0   ;;  %vm910_vm1 = vcmask 523264  }
  0x5d   : > { %s2343_s22 = smov (!%p408_p9, %s1530_s22), 3  ;;  %v1535_v43 = vld [vmem:[%s2304_s7] ss:$0 sm:$0xff]  ;;  %v507_v56 = vunpack.c.l.bf16 %v1537_v51  ;;  %v522_v57 = vunpack.c.h.bf16 %v1537_v51  ;;  %v1541_v63 = vld [vmem:[%s2302_s5 + $0x18] sm:$0xf]  ;;  %vm923_vm2 = vcmask 1043456  }
  0x5e   : > { %s1531_s23 = sshll.u32 %s2343_s22, 3  ;;  %vm919_vm3 = vcmask 64512   ;;  %s406_s14 = scalar_lea.vmem [#allocation8], %s2042_s18 }
  0x5f   : > { %s411_s20 = scalar_lea.vmem %s2297_s0, %s1531_s23  ;;  %s418_s15 = scalar_lea.vmem %s2299_s2, %s1531_s23 }
  0x60   : > { %v2060_v1 = vld [vmem:[%s411_s20] sm:$0xff]  ;;  %v2065_v3 = vld [vmem:[%s411_s20 + $0x8] sm:$0xff]  ;;  %s1379_s22 = sshll.u32 %s406_s14, 4  ;;  %s1561_s23 = sshll.u32 %s1924_s13, 8  ;;  %s2205_s22 = int_to_ptr.vmem [resolvable:$true] %s1379_s22 }
  0x61   : > { %425 = vadd.xlane.f32.xlu0 %v2060_v1  ;;  %v432_v2 = vmul.f32 %v2060_v1, %v2060_v1  ;;  %v433_v4 = vmul.f32 %v2065_v3, %v2065_v3  ;;  %v471_v5 = vld [vmem:[%s418_s15 + $0x8] sm:$0xff]  ;;  %v470_v7 = vld [vmem:[%s418_s15] sm:$0xff]  ;;  %s1844_s15 = smov 64   ;;  %s2202_s28 = scalar_lea.vmem [#allocation7], %s2042_s18 }
  0x62   : > { %v473_v6 = vsub.f32 1.0, %v471_v5  ;;  %v472_v8 = vsub.f32 1.0, %v470_v7  ;;  %s1363_s16 = sshll.u32 %s2202_s28, 4  ;;  %s2214_s26 = scalar_lea.hbm %s2306_s9, %s1561_s23  ;;  %s2216_s16 = int_to_ptr.vmem [resolvable:$true] %s1363_s16 }
  0x63   : > { %434 = vadd.xlane.f32.xlu1 %v432_v2  ;;  %s2221_s18 = scalar_lea.hbm %s2305_s8, %s1561_s23  ;;  %s1729_s17 = scalar_lea.vmem %s2205_s22, 256 }
  0x64   : > { %p1730_p10 = scmp.ne.s32.totalorder %s2205_s22, %s1729_s17  ;;  %p2333_p2 = scmp.ne.s32.totalorder %s2321_s21, 0 }
  0x65   : > { %427 = vadd.xlane.f32.xlu0 %v2065_v3  ;;  %s1849_s24 = smov [#allocation8]  }
  0x66   : > { %p1731_p4 = pnand %p1730_p10, %p2333_p2  ;;  %s1733_s19 = sshll.u32 %s1849_s24, 4  ;;  %s1734_s19 = int_to_ptr.vmem [resolvable:$false] %s1733_s19 }
  0x67   : > { %436 = vadd.xlane.f32.xlu1 %v433_v4  ;;  %s1735_s25 = scalar_lea.vmem %s1734_s19, 512  ;;  %p1736_p0 = scmp.lt.s32.totalorder %s2205_s22, %s1734_s19 }
  0x68   : > { %p1732_p5 = pneg %p1731_p4  ;;  %p1737_p6 = scmp.lt.s32.totalorder %s1735_s25, %s1729_s17 }
  0x6a   : > { %p1738_p13 = por %p1737_p6, %p1736_p0 }
  0x6c   : > { %p1739_p7 = pnand %p1738_p13, %p1732_p5 }
  0x78   : > { %483 = vperm.xlu1 %1658, %v473_v6  }
  0x7b   : > { %478 = vperm.xlu0 %1657, %v472_v8  }
  0x7c   : > { %1659 = vset.pattern.permute.xlu1 %v1838_v9  ;;  %v567_v9 = vunpack.c.l.bf16 %v1541_v63 }
  0x7d   : > { %494 = vperm.xlu1 %1659, %v472_v8  }
  0x7f   : > { %1663 = vset.pattern.permute.xlu0 %v1839_v10 }
  0x80   : > { %543 = vperm.xlu0 %1663, %v473_v6  }
  0x81   : > { %498 = vperm.xlu1 %1659, %v473_v6  }
  0x84   : > { %1665 = vset.pattern.permute.xlu0 %v1840_v11 }
  0x85   : > { %1660 = vset.pattern.permute.xlu1 %v1841_v12  ;;  %569 = vperm.xlu0 %1665, %v472_v8  }
  0x86   : > { %509 = vperm.xlu1 %1660, %v472_v8  }
  0x8a   : > { %513 = vperm.xlu1 %1660, %v473_v6  }
  0x8e   : > { %1661 = vset.pattern.permute.xlu1 %v1842_v13 }
  0x8f   : > { %524 = vperm.xlu1 %1661, %v472_v8  }
  0x93   : > { %528 = vperm.xlu1 %1661, %v473_v6  }
  0x97   : > { %1662 = vset.pattern.permute.xlu1 %v1839_v10 }
  0x98   : > { %539 = vperm.xlu1 %1662, %v472_v8  }
  0x9c   : > { %1664 = vset.pattern.permute.xlu1 %v1843_v14 }
  0x9d   : > { %554 = vperm.xlu1 %1664, %v472_v8   ;;  %v552_v8 = vunpack.c.h.bf16 %v1539_v59 }
  0xa1   : > { %558 = vperm.xlu1 %1664, %v473_v6  }
  0xa5   : > { %1666 = vset.pattern.permute.xlu1 %v1840_v11 }
  0xa6   : > { %573 = vperm.xlu1 %1666, %v473_v6  }
  0xee   : > { %v426_v15 = vpop.xlane.xlu0 %425 }
  0xef   : > { %v430_v16 = vmul.f32 0.0078125, %v426_v15 }
  0xf0   : > { %v435_v17 = vpop.xlane.xlu1 %434 }
  0xf1   : > { %v440_v18 = vmul.f32 %v430_v16, %v430_v16  ;;  %v438_v19 = vmul.f32 0.0078125, %v435_v17  ;;  %v444_v32 = vsub.f32 %v2060_v1, %v430_v16 }
  0xf2   : > { %v428_v20 = vpop.xlane.xlu0 %427 }
  0xf3   : > { %v442_v21 = vsub.f32 %v438_v19, %v440_v18  ;;  %v431_v22 = vmul.f32 0.0078125, %v428_v20 }
  0xf4   : > { %v437_v23 = vpop.xlane.xlu1 %436 }
  0xf5   : > { %v446_v24 = vadd.f32 1e-05, %v442_v21  ;;  %v441_v25 = vmul.f32 %v431_v22, %v431_v22  ;;  %v439_v26 = vmul.f32 0.0078125, %v437_v23  ;;  %v445_v36 = vsub.f32 %v2065_v3, %v431_v22 }
  0xf6   : > { %v537_v3 = vunpack.c.l.bf16 %v1539_v59 }
  0xf7   : > { %v443_v27 = vsub.f32 %v439_v26, %v441_v25  ;;  %1667 = vrsqrt.f32 %v446_v24 }
  0xf8   : > { %v484_v28 = vpop.permute.xlu1 %483 }
  0xf9   : > { %v447_v29 = vadd.f32 1e-05, %v443_v27  ;;  %v487_v58 = vmul.f32 %v484_v28, %v475_v45 }
  0xfa   : > { %v479_v44 = vpop.permute.xlu0 %478 }
  0xfb   : > { %1669 = vrsqrt.f32 %v447_v29  ;;  %v486_v47 = vmul.f32 %v479_v44, %v475_v45 }
  0xfc   : > { %v495_v30 = vpop.permute.xlu1 %494 }
  0xfd   : > { %v501_v55 = vmul.f32 %v495_v30, %v492_v50 }
  0xff   : > { %v544_v62 = vpop.permute.xlu0 %543 }
 0x100   : > { %v499_v31 = vpop.permute.xlu1 %498  ;;  %v547_v22 = vmul.f32 %v544_v62, %v537_v3 }
 0x101   : > { %v1668_v33 = vpop.eup %1667  ;;  %v502_v5 = vmul.f32 %v499_v31, %v492_v50 }
 0x102   : > { %v450_v34 = vmul.f32 %v1668_v33, %v444_v32  ;;  %v1845_v33 = vmov 1983009808  }
 0x104   : > { %v459_v40 = vmul.f32 %v1534_v37, %v450_v34  ;;  %v570_v11 = vpop.permute.xlu0 %569  ;;  %v589_v34 = vunpack.c.l.s4 %v1845_v33 }
 0x105   : > { %v510_v35 = vpop.permute.xlu1 %509  ;;  %v1670_v38 = vpop.eup %1669  ;;  %v576_v18 = vmul.f32 %v570_v11, %v567_v9 }
 0x106   : > { %v451_v42 = vmul.f32 %v1670_v38, %v445_v36  ;;  %v468_v46 = vadd.f32 %v1535_v43, %v459_v40  ;;  %v516_v1 = vmul.f32 %v510_v35, %v507_v56  ;;  %v591_v35 = vlaneseq }
 0x107   : > { %v590_v36 = vunpack.c.0.s8 %v589_v34  ;;  %v1846_v38 = vmov 1934713408  }
 0x108   : > { %v460_v48 = vmul.f32 %v1534_v37, %v451_v42  ;;  %v488_v52 = vadd.f32 %v486_v47, %v468_v46  ;;  %v592_v37 = vshrl.u32 %v591_v35, 7  ;;  %v597_v39 = vunpack.c.l.s4 %v1846_v38 }
 0x109   : > { %v514_v41 = vpop.permute.xlu1 %513 }
 0x10a   : > { %v469_v53 = vadd.f32 %v1535_v43, %v460_v48  ;;  %v503_v60 = vadd.f32 %v501_v55, %v488_v52  ;;  %v517_v13 = vmul.f32 %v514_v41, %v507_v56  ;;  %v2095_v40 = vsub.s32 %v590_v36, %v592_v37 }
 0x10b   : > { %v598_v41 = vunpack.c.0.s8 %v597_v39 }
 0x10c   : > { %v489_v61 = vadd.f32 %v487_v58, %v469_v53  ;;  %v518_v6 = vadd.f32 %v516_v1, %v503_v60 }
 0x10d   : > { %v2098_v43 = vsub.s32 %v598_v41, %v592_v37 }
 0x10e   : > { %v525_v49 = vpop.permute.xlu1 %524  ;;  %v504_v10 = vadd.f32 %v502_v5, %v489_v61 }
 0x10f   : > { %v531_v2 = vmul.f32 %v525_v49, %v522_v57 }
 0x110   : > { %v519_v19 = vadd.f32 %v517_v13, %v504_v10 }
 0x111   : > { %v533_v12 = vadd.f32 %v531_v2, %v518_v6 }
 0x112   : > { %v529_v54 = vpop.permute.xlu1 %528 }
 0x113   : > { %v532_v14 = vmul.f32 %v529_v54, %v522_v57 }
 0x115   : > { %v534_v21 = vadd.f32 %v532_v14, %v519_v19 }
 0x117   : > { %v540_v4 = vpop.permute.xlu1 %539  ;;  %v549_v27 = vadd.f32 %v547_v22, %v534_v21 }
 0x118   : > { %v546_v7 = vmul.f32 %v540_v4, %v537_v3 }
 0x11a   : > { %v548_v16 = vadd.f32 %v546_v7, %v533_v12 }
 0x11c   : > { %v555_v15 = vpop.permute.xlu1 %554 }
 0x11d   : > { %v561_v17 = vmul.f32 %v555_v15, %v552_v8 }
 0x11f   : > { %v563_v20 = vadd.f32 %v561_v17, %v548_v16 }
 0x120   : > { %v559_v23 = vpop.permute.xlu1 %558 }
 0x121   : > { %v578_v24 = vadd.f32 %v576_v18, %v563_v20  ;;  %v562_v25 = vmul.f32 %v559_v23, %v552_v8 }
 0x123   : > { %v580_v26 = vpack.c.bf16 %v578_v24, %v578_v24  ;;  %v564_v29 = vadd.f32 %v562_v25, %v549_v27 }
 0x125   : > { %584 = vrot.lane.b32.xlu1 %v580_v26, %s1844_s15  ;;  %v574_v28 = vpop.permute.xlu1 %573  ;;  %v594_v42 = vrot.slane %v580_v26, %v2095_v40 }
 0x126   : > { %v577_v30 = vmul.f32 %v574_v28, %v567_v9 }
 0x127   : > { %v595_v44 = vcombine.high %v594_v42, %v1837_v0  ;;  %v602_v46 = vrot.slane %v594_v42, %v2098_v43 }
 0x128   : > { %v579_v31 = vadd.f32 %v577_v30, %v564_v29 }
 0x129   : > { %v609_v47 = vrot.slane %v595_v44, %v2098_v43  ;;  %v610_v50 = vcombine.high %v602_v46, %v1837_v0  ;;  %v689_v57 = vshrl.u32 %v602_v46, 16 }
 0x12a   : > { %v581_v32 = vpack.c.bf16 %v579_v31, %v579_v31 }
 0x12b   : > { %v611_v54 = vcombine.high %v609_v47, %v1837_v0  ;;  %v695_v58 = vshrl.u32 %v610_v50, 16  ;;  %v701_v60 = vshrl.u32 %v609_v47, 16 }
 0x12c   : > { %586 = vrot.lane.b32.xlu0 %v581_v32, %s1844_s15  ;;  %v643_v45 = vrot.slane %v581_v32, %v2095_v40 }
 0x12d   : > { %v707_v1 = vshrl.u32 %v611_v54, 16 }
 0x12e   : > { %v644_v48 = vcombine.high %v643_v45, %v1837_v0  ;;  %v651_v49 = vrot.slane %v643_v45, %v2098_v43 }
 0x130   : > { %v658_v53 = vrot.slane %v644_v48, %v2098_v43  ;;  %v659_v59 = vcombine.high %v651_v49, %v1837_v0  ;;  %v713_v4 = vshrl.u32 %v651_v49, 16 }
 0x132   : > { %v660_v3 = vcombine.high %v658_v53, %v1837_v0  ;;  %v719_v13 = vshrl.u32 %v659_v59, 16  ;;  %v725_v17 = vshrl.u32 %v658_v53, 16 }
 0x134   : > { %v731_v21 = vshrl.u32 %v660_v3, 16 }
 0x197   : > { %v585_v51 = vpop.permute.xlu1 %584 }
 0x198   : > { %v619_v52 = vrot.slane %v585_v51, %v2095_v40 }
 0x19a   : > { %v620_v55 = vcombine.high %v619_v52, %v1837_v0  ;;  %v627_v56 = vrot.slane %v619_v52, %v2098_v43 }
 0x19c   : > { %v634_v61 = vrot.slane %v620_v55, %v2098_v43  ;;  %v635_v62 = vcombine.high %v627_v56, %v1837_v0  ;;  %v690_v63 = vshrl.u32 %v627_v56, 16  ;;  %v2115_v2 = vpack.i.b16 %v627_v56, %v602_v46 }
 0x19e   : > { %v636_v5 = vcombine.high %v634_v61, %v1837_v0  ;;  %v2119_v6 = vpack.i.b16 %v690_v63, %v689_v57  ;;  %v2121_v7 = vpack.i.b16 %v635_v62, %v610_v50  ;;  %v696_v8 = vshrl.u32 %v635_v62, 16  ;;  %v587_v9 = vpop.permute.xlu0 %586 }
 0x19f   : > { %v700_v10 = vpack.i.b16 %v634_v61, %v609_v47  ;;  %v702_v11 = vshrl.u32 %v634_v61, 16  ;;  %v668_v12 = vrot.slane %v587_v9, %v2095_v40  ;;  %v738_v19 = vshrl.u32 %v2115_v2, 16 }
 0x1a0   : > { %v697_v14 = vpack.i.b16 %v696_v8, %v695_v58  ;;  %v706_v15 = vpack.i.b16 %v636_v5, %v611_v54  ;;  %v708_v16 = vshrl.u32 %v636_v5, 16  ;;  %v746_v23 = vshrl.u32 %v2119_v6, 16 }
 0x1a1   : > { %v703_v18 = vpack.i.b16 %v702_v11, %v701_v60  ;;  %v669_v20 = vcombine.high %v668_v12, %v1837_v0  ;;  %v754_v24 = vshrl.u32 %v2121_v7, 16  ;;  %v676_v25 = vrot.slane %v668_v12, %v2098_v43 }
 0x1a2   : > { %v709_v22 = vpack.i.b16 %v708_v16, %v707_v1  ;;  %v762_v26 = vshrl.u32 %v697_v14, 16  ;;  %v770_v27 = vshrl.u32 %v700_v10, 16  ;;  %v786_v28 = vshrl.u32 %v706_v15, 16 }
 0x1a3   : > { %v683_v29 = vrot.slane %v669_v20, %v2098_v43  ;;  %v778_v30 = vshrl.u32 %v703_v18, 16  ;;  %v684_v31 = vcombine.high %v676_v25, %v1837_v0  ;;  %v712_v32 = vpack.i.b16 %v676_v25, %v651_v49 }
 0x1a4   : > { %v714_v33 = vshrl.u32 %v676_v25, 16  ;;  %v794_v34 = vshrl.u32 %v709_v22, 16 }
 0x1a5   : > { %v685_v35 = vcombine.high %v683_v29, %v1837_v0  ;;  %v724_v36 = vpack.i.b16 %v683_v29, %v658_v53  ;;  %v726_v37 = vshrl.u32 %v683_v29, 16  ;;  %v718_v39 = vpack.i.b16 %v684_v31, %v659_v59 }
 0x1a6   : > { %v715_v38 = vpack.i.b16 %v714_v33, %v713_v4  ;;  %v720_v41 = vshrl.u32 %v684_v31, 16  ;;  %v736_v42 = vpack.i.b16 %v712_v32, %v2115_v2  ;;  %v739_v47 = vshrl.u32 %v712_v32, 16 }
 0x1a7   : > { %v727_v44 = vpack.i.b16 %v726_v37, %v725_v17  ;;  %v730_v45 = vpack.i.b16 %v685_v35, %v660_v3  ;;  %v732_v46 = vshrl.u32 %v685_v35, 16  ;;  %v752_v49 = vpack.i.b16 %v718_v39, %v2121_v7 }
 0x1a8   : > { %v721_v48 = vpack.i.b16 %v720_v41, %v719_v13  ;;  %v744_v50 = vpack.i.b16 %v715_v38, %v2119_v6  ;;  %v747_v51 = vshrl.u32 %v715_v38, 16  ;;  %v740_v54 = vpack.i.b16 %v739_v47, %v738_v19  ;;  %v917_v47 = vld [vmem:[%s2300_s3] sm:$0xf] }
 0x1a9   : > { %v733_v52 = vpack.i.b16 %v732_v46, %v731_v21  ;;  %v755_v0 = vshrl.u32 %v718_v39, 16  ;;  %v768_v53 = vpack.i.b16 %v724_v36, %v700_v10  ;;  %v771_v58 = vshrl.u32 %v724_v36, 16 }
 0x1aa   : > { %v748_v55 = vpack.i.b16 %v747_v51, %v746_v23  ;;  %v760_v56 = vpack.i.b16 %v721_v48, %v697_v14  ;;  %v763_v57 = vshrl.u32 %v721_v48, 16  ;;  %v776_v60 = vpack.i.b16 %v727_v44, %v703_v18  ;;  %v918_v51 = vld [vmem:[%s2300_s3 + $0x4] sm:$0xf] }
 0x1ab   : > { %v756_v59 = vpack.i.b16 %v755_v0, %v754_v24  ;;  %v779_v61 = vshrl.u32 %v727_v44, 16  ;;  %v784_v62 = vpack.i.b16 %v730_v45, %v706_v15  ;;  %v772_v1 = vpack.i.b16 %v771_v58, %v770_v27 }
 0x1ac   : > { %v764_v63 = vpack.i.b16 %v763_v57, %v762_v26  ;;  %v787_v2 = vshrl.u32 %v730_v45, 16  ;;  %v792_v3 = vpack.i.b16 %v733_v52, %v709_v22  ;;  %v795_v5 = vshrl.u32 %v733_v52, 16 }
 0x1ad   : > { %v780_v4 = vpack.i.b16 %v779_v61, %v778_v30  ;;  %v798_v6 = vcombine.low %v736_v42, %v768_v53  ;;  %v806_v7 = vcombine.low %v752_v49, %v784_v62  ;;  %v822_v9 = vcombine.low %v744_v50, %v776_v60 }
 0x1ae   : > { %v788_v8 = vpack.i.b16 %v787_v2, %v786_v28  ;;  %v846_v11 = vcombine.low %v740_v54, %v772_v1  ;;  %v830_v10 = vcombine.low %v760_v56, %v792_v3  ;;  %v796_v14 = vpack.i.b16 %v795_v5, %v794_v34 }
 0x1af   : > { %v805_v12 = vrot.slane %v798_v6, %v2095_v40  ;;  %v813_v13 = vrot.slane %v806_v7, %v2095_v40  ;;  %v870_v16 = vcombine.low %v748_v55, %v780_v4  ;;  %v829_v15 = vrot.slane %v822_v9, %v2095_v40 }
 0x1b0   : > { %v837_v17 = vrot.slane %v830_v10, %v2095_v40  ;;  %v854_v18 = vcombine.low %v756_v59, %v788_v8  ;;  %v878_v20 = vcombine.low %v764_v63, %v796_v14  ;;  %v853_v22 = vrot.slane %v846_v11, %v2095_v40 }
 0x1b1   : > { %v814_v19 = vcombine.low %v805_v12, %v813_v13  ;;  %v1847_v24 = vmov 0.0   ;;  %v877_v26 = vrot.slane %v870_v16, %v2095_v40 }
 0x1b2   : > { %v838_v21 = vcombine.low %v829_v15, %v837_v17  ;;  %v861_v23 = vrot.slane %v854_v18, %v2095_v40  ;;  %1567 = vmatprep.subr.bf16.mxu0 %v1847_v24  ;;  %1573 = vmatprep.subr.bf16.mxu1 %v1847_v24  ;;  %v885_v27 = vrot.slane %v878_v20, %v2095_v40 }
 0x1b3   : > { %v821_v25 = vrot.slane %v814_v19, %v2098_v43  ;;  %1569 = vmatprep.mubr.msk.bf16.mxu0 %vm1848_vm0, %v1847_v24  ;;  %1575 = vmatprep.mubr.msk.bf16.mxu1 %vm1848_vm0, %v1847_v24 }
 0x1b4   : > { %v845_v28 = vrot.slane %v838_v21, %v2098_v43  ;;  %v862_v29 = vcombine.low %v853_v22, %v861_v23  ;;  %v886_v30 = vcombine.low %v877_v26, %v885_v27 }
 0x1b5   : > { %v897_v31 = vshrl.u32 %v821_v25, 16 }
 0x1b6   : > { %v898_v32 = vshrl.u32 %v845_v28, 16  ;;  %v869_v33 = vrot.slane %v862_v29, %v2098_v43  ;;  %v896_v34 = vpack.i.b16 %v845_v28, %v821_v25  ;;  %v893_v35 = vrot.slane %v886_v30, %v2098_v43 }
 0x1b8   : > { %v899_v36 = vpack.i.b16 %v898_v32, %v897_v31  ;;  %v903_v37 = vshrl.u32 %v869_v33, 16  ;;  %v904_v38 = vshrl.u32 %v893_v35, 16  ;;  %v902_v39 = vpack.i.b16 %v893_v35, %v869_v33 }
 0x1ba   : > { %906 = vrot.lane.b32.xlu1 %v899_v36, %s1844_s15  ;;  %v905_v41 = vpack.i.b16 %v904_v38, %v903_v37 }
 0x1bc   : > { %908 = vrot.lane.b32.xlu0 %v905_v41, %s1844_s15 }
 0x22c   : > { %v907_v42 = vpop.permute.xlu1 %906 }
 0x22d   : > { %v913_v44 = vsel %vm910_vm1, %v896_v34, %v907_v42 }
 0x22e   : > { %v924_v45 = vsel %vm923_vm2, %v913_v44, 0  ;;  %v909_v46 = vpop.permute.xlu0 %908 }
 0x22f   : > { %1568 = vmatpush3.bf16.msra.mxu0 %v924_v45  ;;  %v916_v48 = vsel %vm910_vm1, %v902_v39, %v909_v46 }
 0x230   : > { %v969_v50 = vsel %vm923_vm2, %v916_v48, 0 }
 0x231   : > { %1574 = vmatpush3.bf16.msra.mxu1 %v969_v50 }
 0x232   : > { %1570 = vmatmul.mubr.msk.bf16.vlgmr.msra.gmra.mrb[0].mxu0 %vm919_vm3, %v917_v47 }
 0x234   : > { %1576 = vmatmul.mubr.msk.bf16.vlgmr.msra.gmra.mrb[0].mxu1 %vm919_vm3, %v918_v51 }
 0x305   : > { %v960_v49 = vpop.f32.mrb[0].mxu0 }
 0x306   : > { %1013 = vrot.lane.b32.xlu1 %v960_v49, %s1844_s15  ;;  %v1571_v52 = vpop.f32.mrb[1].mxu0  ;;  %v1019_v58 = vcombine.high %v960_v49, %v1847_v24  ;;  %v1026_v60 = vrot.slane %v960_v49, %v2095_v40 }
 0x307   : > { %v963_v54 = vpop.f32.mrb[2].mxu0  ;;  %v1005_v0 = vpop.f32.mrb[0].mxu1 }
 0x308   : > { %v1572_v53 = vpop.f32.mrb[3].mxu0  ;;  %1015 = vrot.lane.b32.xlu0 %v1005_v0, %s1844_s15  ;;  %v1577_v55 = vpop.f32.mrb[1].mxu1  ;;  %v1081_v63 = vcombine.high %v1005_v0, %v1847_v24  ;;  %v1033_v1 = vrot.slane %v1019_v58, %v2095_v40  ;;  %v1088_v5 = vrot.slane %v1005_v0, %v2095_v40 }
 0x309   : > { %v1008_v56 = vpop.f32.mrb[2].mxu1 }
 0x30a   : > { %v1578_v57 = vpop.f32.mrb[3].mxu1  ;;  %v1095_v11 = vrot.slane %v1081_v63, %v2095_v40 }
 0x378   : > { %v1014_v59 = vpop.permute.xlu1 %1013 }
 0x379   : > { %v1034_v61 = vcombine.high %v1014_v59, %v1847_v24  ;;  %v1041_v62 = vrot.slane %v1014_v59, %v2095_v40 }
 0x37a   : > { %v1016_v4 = vpop.permute.xlu0 %1015 }
 0x37b   : > { %v1048_v2 = vrot.slane %v1034_v61, %v2095_v40  ;;  %v1049_v3 = vcombine.low %v1026_v60, %v1041_v62  ;;  %v1096_v6 = vcombine.high %v1016_v4, %v1847_v24  ;;  %v1103_v7 = vrot.slane %v1016_v4, %v2095_v40 }
 0x37c   : > { %v1050_v8 = vcombine.high %v1026_v60, %v1041_v62 }
 0x37d   : > { %v1065_v9 = vcombine.low %v1033_v1, %v1048_v2  ;;  %v1110_v10 = vrot.slane %v1096_v6, %v2095_v40  ;;  %v1111_v12 = vcombine.low %v1088_v5, %v1103_v7  ;;  %v1112_v13 = vcombine.high %v1088_v5, %v1103_v7 }
 0x37e   : > { %v1057_v14 = vrot.slane %v1049_v3, %v2098_v43  ;;  %v1066_v16 = vcombine.high %v1033_v1, %v1048_v2  ;;  %v1064_v20 = vrot.slane %v1050_v8, %v2098_v43  ;;  %v1339_v8 = vld [vmem:[%s353_s11 + $0x8] sm:$0xff] }
 0x37f   : > { %v1119_v15 = vrot.slane %v1111_v12, %v2098_v43  ;;  %v1126_v17 = vrot.slane %v1112_v13, %v2098_v43  ;;  %v1127_v18 = vcombine.low %v1095_v11, %v1110_v10  ;;  %v1128_v19 = vcombine.high %v1095_v11, %v1110_v10  ;;  %v1338_v10 = vld [vmem:[%s353_s11] sm:$0xff]  ;;  %s1350_s11 = scalar_lea.sflag [#allocation9], %s2039_s29 }
 0x380   : > { %v1073_v21 = vrot.slane %v1065_v9, %v2098_v43  ;;  %v1080_v26 = vrot.slane %v1066_v16, %v2098_v43 }
 0x381   : > { %v1135_v22 = vrot.slane %v1127_v18, %v2098_v43  ;;  %v1142_v23 = vrot.slane %v1128_v19, %v2098_v43  ;;  %v1143_v24 = vcombine.low %v1057_v14, %v1119_v15  ;;  %v1544_v25 = vcombine.high %v1057_v14, %v1119_v15 }
 0x382   : > { %v1163_v27 = vcombine.low %v1064_v20, %v1126_v17  ;;  %v1545_v28 = vcombine.high %v1064_v20, %v1126_v17 }
 0x383   : > { %v1150_v29 = vrot.slane %v1143_v24, %v2098_v43  ;;  %v1161_v30 = vrot.slane %v1544_v25, %v2098_v43  ;;  %v1183_v31 = vcombine.low %v1073_v21, %v1135_v22  ;;  %v1546_v32 = vcombine.high %v1073_v21, %v1135_v22 }
 0x384   : > { %v1170_v33 = vrot.slane %v1163_v27, %v2098_v43  ;;  %v1181_v34 = vrot.slane %v1545_v28, %v2098_v43  ;;  %v1203_v35 = vcombine.low %v1080_v26, %v1142_v23  ;;  %v1547_v36 = vcombine.high %v1080_v26, %v1142_v23 }
 0x385   : > { %v1190_v37 = vrot.slane %v1183_v31, %v2098_v43  ;;  %v1201_v38 = vrot.slane %v1546_v32, %v2098_v43 }
 0x386   : > { %v1210_v39 = vrot.slane %v1203_v35, %v2098_v43  ;;  %v1221_v41 = vrot.slane %v1547_v36, %v2098_v43  ;;  %v1223_v42 = vcombine.low %v1150_v29, %v1170_v33  ;;  %v1231_v44 = vcombine.low %v1161_v30, %v1181_v34 }
 0x387   : > { %v1548_v45 = vcombine.high %v1150_v29, %v1170_v33  ;;  %v1549_v46 = vcombine.high %v1161_v30, %v1181_v34 }
 0x388   : > { %v1550_v47 = vcombine.high %v1190_v37, %v1210_v39  ;;  %v1551_v48 = vcombine.high %v1201_v38, %v1221_v41  ;;  %v1230_v50 = vrot.slane %v1223_v42, %v2095_v40  ;;  %v1238_v51 = vrot.slane %v1231_v44, %v2095_v40 }
 0x389   : > { %v1280_v49 = vrot.slane %v1548_v45, %v2095_v40  ;;  %v1288_v52 = vrot.slane %v1549_v46, %v2095_v40  ;;  %v1239_v54 = vcombine.low %v1190_v37, %v1210_v39  ;;  %v1247_v0 = vcombine.low %v1201_v38, %v1221_v41 }
 0x38a   : > { %v1296_v53 = vrot.slane %v1550_v47, %v2095_v40  ;;  %v1304_v55 = vrot.slane %v1551_v48, %v2095_v40  ;;  %v1255_v56 = vcombine.low %v1230_v50, %v1238_v51 }
 0x38b   : > { %v1305_v57 = vcombine.low %v1280_v49, %v1288_v52  ;;  %v1246_v58 = vrot.slane %v1239_v54, %v2095_v40  ;;  %v1254_v59 = vrot.slane %v1247_v0, %v2095_v40  ;;  %v1333_v40 = vld [vmem:[#allocation5] sm:$0xff] }
 0x38c   : > { %v1313_v60 = vcombine.low %v1296_v53, %v1304_v55  ;;  %v1262_v1 = vrot.slane %v1255_v56, %v2098_v43 }
 0x38d   : > { %v1263_v61 = vcombine.low %v1246_v58, %v1254_v59  ;;  %v1312_v62 = vrot.slane %v1305_v57, %v2098_v43 }
 0x38e   : > { %v1320_v63 = vrot.slane %v1313_v60, %v2098_v43 }
 0x38f   : > { %v1270_v2 = vrot.slane %v1263_v61, %v2098_v43 }
 0x390   : > { %v1322_v3 = vcombine.high %v1312_v62, %v1320_v63  ;;  %v1321_v4 = vcombine.low %v1312_v62, %v1320_v63 }
 0x391   : > { %v1272_v5 = vcombine.high %v1262_v1, %v1270_v2  ;;  %v1271_v6 = vcombine.low %v1262_v1, %v1270_v2 }
 0x392   : > { %1327 = vrot.lane.b32.xlu0 %v1322_v3, %s1844_s15 }
 0x393   : > { %1325 = vrot.lane.b32.xlu1 %v1272_v5, %s1844_s15 }
 0x404   : > { %v1328_v7 = vpop.permute.xlu0 %1327 }
 0x405   : > { %v1332_v43 = vsel %vm910_vm1, %v1321_v4, %v1328_v7  ;;  %v1326_v9 = vpop.permute.xlu1 %1325 }
 0x406   : > { %v1335_v11 = vadd.f32 %v1333_v40, %v1332_v43  ;;  %v1331_v12 = vsel %vm910_vm1, %v1271_v6, %v1326_v9 }
 0x407   : > { %v1334_v13 = vadd.f32 %v1333_v40, %v1331_v12 }
 0x408   : > { %1337 = vst [vmem:[%s406_s14 + $0x8] sm:$0xff] %v1335_v11  ;;  %v1341_v14 = vmul.f32 %v1339_v8, %v1335_v11 }
 0x409   : > { %1336 = vst [vmem:[%s406_s14] sm:$0xff] %v1334_v13  ;;  %v1340_v16 = vmul.f32 %v1338_v10, %v1334_v13 }
 0x40a   : > { %1343 = vst [vmem:[%s2202_s28 + $0x8] sm:$0xff] %v1341_v14 }
 0x40b   : > { %1742 = shalt.err (!%p1739_p7)
}
 0x40c   : > { %s1743_s14 = scalar_lea.hbm %s2214_s26, 256  ;;  %s1747_s20 = scalar_lea.hbm %s2306_s9, 512 }
 0x40d   : > { %p1744_p3 = scmp.ne.s32.totalorder %s2214_s26, %s1743_s14  ;;  %p1748_p11 = scmp.lt.u32.totalorder %s2214_s26, %s2306_s9 }
 0x40e   : > { %p1749_p8 = scmp.lt.u32.totalorder %s1747_s20, %s1743_s14  ;;  %p1751_p10 = scmp.lt.u32.totalorder %s1743_s14, %s2214_s26 }
 0x40f   : > { %p1745_p12 = pnand %p1744_p3, %p2333_p2 }
 0x410   : > { %p1750_p9 = por %p1749_p8, %p1748_p11 }
 0x411   : > { %p1746_p1 = pneg %p1745_p12 }
 0x412   : > { %p1752_p4 = por %p1751_p10, %p1750_p9 }
 0x414   : > { %p1753_p5 = pnand %p1752_p4, %p1746_p1 }
 0x416   : > { %1756 = shalt.err (!%p1753_p5)
}
 0x417   : > { %s1850_s17 = smov 128   ;;  %s1851_s24 = smov 8   ;;  %1342 = vst [vmem:[%s2202_s28] sm:$0xff] %v1340_v16 }
 0x418   : > { %1586 = dma.vmem_to_hbm [thread:$0]  (%p2333_p2), %s2205_s22, 256, %s2214_s26, %s1350_s11, %s1850_s17, %s1850_s17, %s1851_s24  }
 0x419   : > { %s1345_s19 = scalar_lea.sflag [#allocation4], %s2039_s29  ;;  %s1757_s25 = scalar_lea.vmem %s2216_s16, 256 }
 0x41a   : > { %p1758_p0 = scmp.ne.s32.totalorder %s2216_s16, %s1757_s25  ;;  %s1852_s14 = smov [#allocation7]  }
 0x41b   : > { %s1761_s23 = sshll.u32 %s1852_s14, 4  ;;  %s1762_s23 = int_to_ptr.vmem [resolvable:$false] %s1761_s23 }
 0x41c   : > { %p1759_p6 = pnand %p1758_p0, %p2333_p2  ;;  %s1763_s13 = scalar_lea.vmem %s1762_s23, 512 }
 0x41d   : > { %p1764_p7 = scmp.lt.s32.totalorder %s2216_s16, %s1762_s23  ;;  %p1765_p3 = scmp.lt.s32.totalorder %s1763_s13, %s1757_s25 }
 0x41e   : > { %p1760_p13 = pneg %p1759_p6 }
 0x41f   : > { %p1766_p12 = por %p1765_p3, %p1764_p7 }
 0x421   : > { %p1767_p1 = pnand %p1766_p12, %p1760_p13 }
 0x423   : > { %1770 = shalt.err (!%p1767_p1)
}
 0x424   : > { %s1771_s22 = scalar_lea.hbm %s2221_s18, 256  ;;  %s1775_s11 = scalar_lea.hbm %s2305_s8, 512 }
 0x425   : > { %p1772_p11 = scmp.ne.s32.totalorder %s2221_s18, %s1771_s22  ;;  %p1776_p10 = scmp.lt.u32.totalorder %s2221_s18, %s2305_s8 }
 0x426   : > { %p1777_p4 = scmp.lt.u32.totalorder %s1775_s11, %s1771_s22  ;;  %p1779_p0 = scmp.lt.u32.totalorder %s1771_s22, %s2221_s18 }
 0x427   : > { %p1773_p8 = pnand %p1772_p11, %p2333_p2 }
 0x428   : > { %p1778_p5 = por %p1777_p4, %p1776_p10 }
 0x429   : > { %p1774_p9 = pneg %p1773_p8 }
 0x42a   : > { %p1780_p6 = por %p1779_p0, %p1778_p5 }
 0x42c   : > { %p1781_p13 = pnand %p1780_p6, %p1774_p9 }
 0x42e   : > { %1784 = shalt.err (!%p1781_p13)
}
 0x42f   : > { %1585 = dma.vmem_to_hbm [thread:$0]  (%p2333_p2), %s2216_s16, 256, %s2221_s18, %s1345_s19, %s1850_s17, %s1850_s17, %s1851_s24  }
 0x430 PF: > { %s2334_s15 = sld [smem:[#allocation17_spill]]  ;;  %s1394_s25 = sand.u32 1, %s1819_s30  }
 0x431   : > { %p2336_p3 = scmp.ge.s32.totalorder %s1831_s12, 2  ;;  %s1395_s14 = scalar_lea.sflag [#allocation4], %s1394_s25 }
 0x436   : > { %p2335_p7 = scmp.ne.s32.totalorder %s2334_s15, 0 }
 0x438   : > { %p1598_p12 = pnand %p2336_p3, %p2335_p7 }
 0x43a   : > { %1810 = dma.done.wait (!%p1598_p12), %s1395_s14, 256  }
 0x43b   : > { %1812 = vsyncadd (!%p1598_p12), %s1395_s14, 4294967040  ;;  %s1404_s21 = scalar_lea.sflag [#allocation9], %s1394_s25 }
 0x43c   : > { %1814 = dma.done.wait (!%p1598_p12), %s1404_s21, 256  }
 0x43d   : > { %1816 = vsyncadd (!%p1598_p12), %s1404_s21, 4294967040  ;;  %s2337_s12 = sld [smem:[#allocation15_spill]]  ;;  %s2338_s29 = sld [smem:[#allocation14_spill]] }
 0x43e   : > { %s2339_s11 = sld [smem:[#allocation16_spill]]  ;;  %s2340_s30 = smov %s1823_s10 }
 0x443   : > { %p27_p2 = scmp.ge.s32.totalorder %s2337_s12, 4   ;;  %s2341_s10 = smov %s2338_s29 }
 0x445   :  { %29 = sbr.rel (!%p27_p2) target bundleno = 8 (0x8), region = 130 }
 0x44c   :  { %1409 = vsyncpa [#allocation3], 1 }
 0x44d   :  { %1411 = vsyncpa [#allocation3 + $0x1], 1 }
 0x44e   :  { %1412 = vsyncpa [#allocation6], 1 }
 0x44f   :  { %1413 = vsyncpa [#allocation4], 1 }
 0x450   :  { %1415 = vsyncpa [#allocation4 + $0x1], 1 }
 0x451   :  { %1416 = vsyncpa [#allocation9], 1 }
 0x452   :  { %1418 = vsyncpa [#allocation9 + $0x1], 1 }

</bundles_post_ra>
